<compile_context>
chip_gen: v7x
topology: tpu7x:2x2x1
jax: 0.10.0
libtpu: 0.0.40
codegen_flags: <defaults>
</compile_context>

<pallas_src>
import functools

import jax
import jax.numpy as jnp
from jax.experimental import pallas as pl
from jax.experimental.pallas import tpu as pltpu

EPS = 1e-5  # PyTorch LayerNorm default eps


def _layernorm(x, w, b):
    mu = jnp.mean(x, axis=-1, keepdims=True)
    var = jnp.mean((x - mu) ** 2, axis=-1, keepdims=True)
    return (x - mu) * jax.lax.rsqrt(var + EPS) * w + b


# ---------------------------------------------------------------------------
# Fused decoder kernel: one transformer block per (batch, layer) grid step;
# final LayerNorm + head fused into the last layer step.
# ---------------------------------------------------------------------------
def decoder_kernel(num_heads,
                   x_ref, pos_ref,
                   ln1w_ref, ln1b_ref, wqkv_ref, bqkv_ref, wo_ref, bo_ref,
                   ln2w_ref, ln2b_ref, w1_ref, b1_ref, w2_ref, b2_ref,
                   nw_ref, nb_ref, hw_ref, hb_ref,
                   o_ref, x_scratch):
    l = pl.program_id(1)
    bf16 = jnp.bfloat16

    @pl.when(l == 0)
    def _():
        # Initialize the residual stream (input tile + positional embedding).
        x_scratch[...] = x_ref[0] + pos_ref[0]

    x = x_scratch[...]                              # (S, D) f32 residual stream
    S, D = x.shape
    H = num_heads
    hd = D // H
    scale = 1.0 / (hd ** 0.5)

    # ---- multi-head self-attention (pre-norm) ----
    h = _layernorm(x, ln1w_ref[0], ln1b_ref[0])
    qkv = (jnp.dot(h.astype(bf16), wqkv_ref[0],
                   preferred_element_type=jnp.float32) + bqkv_ref[0])   # (S, 3D) f32
    q = qkv[:, 0 * D:1 * D] * scale                 # fold 1/sqrt(hd) into q
    k = qkv[:, 1 * D:2 * D]
    v = qkv[:, 2 * D:3 * D]
    # split heads -> (H, S, hd); batched leading-head contractions on the MXU
    qh = jnp.stack([q[:, i * hd:(i + 1) * hd] for i in range(H)], 0).astype(bf16)
    kh = jnp.stack([k[:, i * hd:(i + 1) * hd] for i in range(H)], 0).astype(bf16)
    vh = jnp.stack([v[:, i * hd:(i + 1) * hd] for i in range(H)], 0).astype(bf16)
    s = jnp.einsum('hqd,hkd->hqk', qh, kh, preferred_element_type=jnp.float32)
    s = s - jnp.max(s, axis=-1, keepdims=True)
    p = jnp.exp(s)
    p = p * pl.reciprocal(jnp.sum(p, axis=-1, keepdims=True), approx=True)
    ctx = jnp.einsum('hqk,hkd->hqd', p.astype(bf16), vh,
                     preferred_element_type=jnp.float32)                # (H, S, hd)
    attn = jnp.concatenate([ctx[i] for i in range(H)], axis=-1)         # (S, D)
    attn = (jnp.dot(attn.astype(bf16), wo_ref[0],
                    preferred_element_type=jnp.float32) + bo_ref[0])
    x = x + attn                                    # dropout: identity (eval)

    # ---- MLP (pre-norm) ----
    h = _layernorm(x, ln2w_ref[0], ln2b_ref[0])
    h = (jnp.dot(h.astype(bf16), w1_ref[0],
                 preferred_element_type=jnp.float32) + b1_ref[0])
    # TODO(synk): PyTorch nn.GELU defaults to exact erf; tanh approximation used here.
    h = jax.nn.gelu(h, approximate=True)
    h = (jnp.dot(h.astype(bf16), w2_ref[0],
                 preferred_element_type=jnp.float32) + b2_ref[0])
    x = x + h                                       # dropout: identity (eval)
    x_scratch[...] = x

    # ---- final LayerNorm + pixel head, only on the last layer step ----
    @pl.when(l == pl.num_programs(1) - 1)
    def _():
        y = _layernorm(x, nw_ref[...], nb_ref[...])
        o_ref[0] = (jnp.dot(y.astype(bf16), hw_ref[...],
                            preferred_element_type=jnp.float32) + hb_ref[...])


# ---------------------------------------------------------------------------
# Parameter initialization (deterministic, synthetic)
# ---------------------------------------------------------------------------
def _xavier_uniform(key, shape):
    fan_in, fan_out = shape[-2], shape[-1]
    limit = (6.0 / (fan_in + fan_out)) ** 0.5
    return jax.random.uniform(key, shape, jnp.float32, -limit, limit)


def init_params(key, enc_dim, dec_dim, num_layers, dim_ff, num_patches, patch_dim):
    keys = jax.random.split(key, 16)
    L, D, F = num_layers, dec_dim, dim_ff
    S = num_patches + 1
    p = {
        "emb_w": _xavier_uniform(keys[0], (enc_dim, D)),
        "emb_b": jnp.zeros((D,), jnp.float32),
        "mask_token": 0.02 * jax.random.normal(keys[1], (1, 1, D), jnp.float32),
        "pos_embed": 0.02 * jax.random.normal(keys[2], (1, S, D), jnp.float32),
        "ln1_w": jnp.ones((L, D), jnp.float32),
        "ln1_b": jnp.zeros((L, D), jnp.float32),
        "wqkv": _xavier_uniform(keys[3], (L, D, 3 * D)),
        "bqkv": jnp.zeros((L, 3 * D), jnp.float32),
        "wo": _xavier_uniform(keys[4], (L, D, D)),
        "bo": jnp.zeros((L, D), jnp.float32),
        "ln2_w": jnp.ones((L, D), jnp.float32),
        "ln2_b": jnp.zeros((L, D), jnp.float32),
        "w1": _xavier_uniform(keys[5], (L, D, F)),
        "b1": jnp.zeros((L, F), jnp.float32),
        "w2": _xavier_uniform(keys[6], (L, F, D)),
        "b2": jnp.zeros((L, D), jnp.float32),
        "norm_w": jnp.ones((D,), jnp.float32),
        "norm_b": jnp.zeros((D,), jnp.float32),
        "head_w": _xavier_uniform(keys[7], (D, patch_dim)),
        "head_b": jnp.zeros((patch_dim,), jnp.float32),
    }
    return p


# ---------------------------------------------------------------------------
# BlockSpec helpers
# ---------------------------------------------------------------------------
def _layer_spec(arr):
    """One-layer slice of a (L, ...) stacked parameter; streamed over grid axis 1."""
    nz = arr.ndim - 1
    return pl.BlockSpec((1,) + arr.shape[1:],
                        lambda b, l, _nz=nz: (l,) + (0,) * _nz)


def _const_spec(arr):
    """Full-array block, constant over the grid (loaded once, stays resident)."""
    nd = arr.ndim
    return pl.BlockSpec(arr.shape, lambda b, l, _nd=nd: (0,) * _nd)


# ---------------------------------------------------------------------------
# Wrapper: full forward pass
# ---------------------------------------------------------------------------
def vit_mae_decoder(x_enc, indices_order_to_restore, params, *, num_layers, num_heads):
    B, Nv1, Denc = x_enc.shape
    Ddec = params["emb_w"].shape[1]
    S = params["pos_embed"].shape[1]          # num_patches + 1
    num_patches = S - 1
    P = params["head_w"].shape[1]
    P_pad = ((P + 127) // 128) * 128          # lane-dense head output
    L = num_layers
    bf16 = jnp.bfloat16

    # 1) encoder->decoder embedding: tiny (B*Nv1, Denc)@(Denc, Ddec); plain JAX.
    emb = jnp.dot(x_enc, params["emb_w"]) + params["emb_b"]          # (B, Nv1, Ddec)

    # 2) glue in plain JAX: mask tokens, restore-order gather, cls concat.
    # TODO(synk): this gather could be fused into the kernel with scalar prefetch
    # (pl.Element row gather) to save one (B, S, D) HBM round trip.
    n_mask = num_patches + 1 - Nv1
    mask_tokens = jnp.broadcast_to(params["mask_token"], (B, n_mask, Ddec))
    cls_token = emb[:, :1, :]
    x_no_cls = emb[:, 1:, :]
    x_ = jnp.concatenate([x_no_cls, mask_tokens], axis=1)            # (B, num_patches, D)
    x_ = jnp.take_along_axis(
        x_, indices_order_to_restore[:, :, None].astype(jnp.int32), axis=1)
    x_seq = jnp.concatenate([cls_token, x_], axis=1)                 # (B, S, D)
    # pos_embed is added inside the kernel at layer 0.

    # 3) weight packaging: bf16 matmul operands; per-layer params keep the layer
    #    axis leading; biases / LN params become (L, 1, dim) so each block's last
    #    two dims equal the full array dims (TPU (8,128) tiling rule).
    per_layer = [
        params["ln1_w"][:, None, :], params["ln1_b"][:, None, :],
        params["wqkv"].astype(bf16), params["bqkv"][:, None, :],
        params["wo"].astype(bf16), params["bo"][:, None, :],
        params["ln2_w"][:, None, :], params["ln2_b"][:, None, :],
        params["w1"].astype(bf16), params["b1"][:, None, :],
        params["w2"].astype(bf16), params["b2"][:, None, :],
    ]
    head_w = jnp.pad(params["head_w"], ((0, 0), (0, P_pad - P))).astype(bf16)
    head_b = jnp.pad(params["head_b"], (0, P_pad - P))[None, :]
    finals = [params["norm_w"][None, :], params["norm_b"][None, :], head_w, head_b]

    in_specs = (
        [pl.BlockSpec((1, S, Ddec), lambda b, l: (b, 0, 0)),   # x_seq (resident per b)
         pl.BlockSpec((1, S, Ddec), lambda b, l: (0, 0, 0))]   # pos_embed (resident)
        + [_layer_spec(w) for w in per_layer]
        + [_const_spec(w) for w in finals])

    y = pl.pallas_call(
        functools.partial(decoder_kernel, num_heads),
        out_shape=jax.ShapeDtypeStruct((B, S, P_pad), jnp.float32),
        grid=(B, L),
        in_specs=in_specs,
        out_specs=pl.BlockSpec((1, S, P_pad), lambda b, l: (b, 0, 0)),
        scratch_shapes=[pltpu.VMEM((S, Ddec), jnp.float32)],
        compiler_params=pltpu.CompilerParams(
            dimension_semantics=("parallel", "arbitrary"),
            vmem_limit_bytes=32 * 1024 * 1024),
    )(x_seq, params["pos_embed"], *per_layer, *finals)

    # 4) drop cls token, strip lane padding back to patch_dim
    return y[:, 1:, :P]


if __name__ == "__main__":
    # Small, consistent config:
    patch, img = 4, 16
    num_patches = (img // patch) * (img // patch)          # 16
    enc_dim, dec_dim = 32, 32
    num_layers, num_heads, dim_ff = 2, 4, 64
    patch_dim = patch * patch * 3                          # 48
    B, n_visible = 2, 8                                    # encoder tokens = cls + 8 visible

    key = jax.random.PRNGKey(0)
    k_param, k_x, k_idx = jax.random.split(key, 3)

    params = init_params(k_param, enc_dim, dec_dim, num_layers, dim_ff,
                         num_patches, patch_dim)

    x_enc = jax.random.normal(k_x, (B, n_visible + 1, enc_dim), jnp.float32)
    idx_keys = jax.random.split(k_idx, B)
    indices = jnp.stack(
        [jax.random.permutation(kk, num_patches) for kk in idx_keys]
    ).astype(jnp.int32)                                    # (B, num_patches)

    out = vit_mae_decoder(x_enc, indices, params,
                          num_layers=num_layers, num_heads=num_heads)
    out = jax.block_until_ready(out)

    assert out.shape == (B, num_patches, patch_dim), out.shape
    assert jnp.all(jnp.isfinite(out))
    print("KERNEL_OK")
</pallas_src>

<mosaic_0001>
module attributes {stable_mosaic.version = 11 : i64} {
  func.func @decoder_kernel(%arg0: i32, %arg1: i32, %arg2: memref<1x17x32xf32, #tpu.memory_space<vmem>>, %arg3: memref<1x17x32xf32, #tpu.memory_space<vmem>>, %arg4: memref<1x1x32xf32, #tpu.memory_space<vmem>>, %arg5: memref<1x1x32xf32, #tpu.memory_space<vmem>>, %arg6: memref<1x32x96xbf16, #tpu.memory_space<vmem>>, %arg7: memref<1x1x96xf32, #tpu.memory_space<vmem>>, %arg8: memref<1x32x32xbf16, #tpu.memory_space<vmem>>, %arg9: memref<1x1x32xf32, #tpu.memory_space<vmem>>, %arg10: memref<1x1x32xf32, #tpu.memory_space<vmem>>, %arg11: memref<1x1x32xf32, #tpu.memory_space<vmem>>, %arg12: memref<1x32x64xbf16, #tpu.memory_space<vmem>>, %arg13: memref<1x1x64xf32, #tpu.memory_space<vmem>>, %arg14: memref<1x64x32xbf16, #tpu.memory_space<vmem>>, %arg15: memref<1x1x32xf32, #tpu.memory_space<vmem>>, %arg16: memref<1x32xf32, #tpu.memory_space<vmem>>, %arg17: memref<1x32xf32, #tpu.memory_space<vmem>>, %arg18: memref<32x128xbf16, #tpu.memory_space<vmem>>, %arg19: memref<1x128xf32, #tpu.memory_space<vmem>>, %arg20: memref<1x17x128xf32, #tpu.memory_space<vmem>>, %arg21: memref<17x32xf32, #tpu.memory_space<vmem>>) attributes {dimension_semantics = [#tpu.dimension_semantics<parallel>, #tpu.dimension_semantics<arbitrary>], iteration_bounds = array<i64: 2, 2>, scalar_prefetch = 0 : i64, scratch_operands = 1 : i64, tpu.core_type = #tpu.core_type<tc>, window_params = [{transform_indices = @transform_0, window_bounds = array<i64: 1, 17, 32>}, {pipeline_mode = #tpu.pipeline_mode<synchronous>, transform_indices = @transform_1, window_bounds = array<i64: 1, 17, 32>}, {transform_indices = @transform_2, window_bounds = array<i64: 1, 1, 32>}, {transform_indices = @transform_3, window_bounds = array<i64: 1, 1, 32>}, {transform_indices = @transform_4, window_bounds = array<i64: 1, 32, 96>}, {transform_indices = @transform_5, window_bounds = array<i64: 1, 1, 96>}, {transform_indices = @transform_6, window_bounds = array<i64: 1, 32, 32>}, {transform_indices = @transform_7, window_bounds = array<i64: 1, 1, 32>}, {transform_indices = @transform_8, window_bounds = array<i64: 1, 1, 32>}, {transform_indices = @transform_9, window_bounds = array<i64: 1, 1, 32>}, {transform_indices = @transform_10, window_bounds = array<i64: 1, 32, 64>}, {transform_indices = @transform_11, window_bounds = array<i64: 1, 1, 64>}, {transform_indices = @transform_12, window_bounds = array<i64: 1, 64, 32>}, {transform_indices = @transform_13, window_bounds = array<i64: 1, 1, 32>}, {pipeline_mode = #tpu.pipeline_mode<synchronous>, transform_indices = @transform_14, window_bounds = array<i64: 1, 32>}, {pipeline_mode = #tpu.pipeline_mode<synchronous>, transform_indices = @transform_15, window_bounds = array<i64: 1, 32>}, {pipeline_mode = #tpu.pipeline_mode<synchronous>, transform_indices = @transform_16, window_bounds = array<i64: 32, 128>}, {pipeline_mode = #tpu.pipeline_mode<synchronous>, transform_indices = @transform_17, window_bounds = array<i64: 1, 128>}, {transform_indices = @transform_18, window_bounds = array<i64: 1, 17, 128>}]} {
    %c0_i32 = arith.constant 0 : i32
    %0 = arith.cmpi eq, %arg1, %c0_i32 : i32
    %1 = arith.extui %0 : i1 to i32
    %c0_i32_0 = arith.constant 0 : i32
    %2 = arith.cmpi ne, %1, %c0_i32_0 : i32
    scf.if %2 {
      %c0_63 = arith.constant 0 : index
      %c0_64 = arith.constant 0 : index
      %c0_65 = arith.constant 0 : index
      %164 = vector.load %arg2[%c0_63, %c0_64, %c0_65] : memref<1x17x32xf32, #tpu.memory_space<vmem>>, vector<1x17x32xf32>
      %165 = vector.shape_cast %164 : vector<1x17x32xf32> to vector<17x32xf32>
      %c0_66 = arith.constant 0 : index
      %c0_67 = arith.constant 0 : index
      %c0_68 = arith.constant 0 : index
      %166 = vector.load %arg3[%c0_66, %c0_67, %c0_68] : memref<1x17x32xf32, #tpu.memory_space<vmem>>, vector<1x17x32xf32>
      %167 = vector.shape_cast %166 : vector<1x17x32xf32> to vector<17x32xf32>
      %168 = arith.addf %165, %167 : vector<17x32xf32>
      %c0_69 = arith.constant 0 : index
      %c0_70 = arith.constant 0 : index
      %169 = vector.load %arg21[%c0_69, %c0_70] : memref<17x32xf32, #tpu.memory_space<vmem>>, vector<17x32xf32>
      tpu.vector_store %arg21[%c0_69, %c0_70], %168 {strides = array<i32>} : memref<17x32xf32, #tpu.memory_space<vmem>>, vector<17x32xf32>,
    } else {
    }
    %c0 = arith.constant 0 : index
    %c0_1 = arith.constant 0 : index
    %3 = vector.load %arg21[%c0, %c0_1] : memref<17x32xf32, #tpu.memory_space<vmem>>, vector<17x32xf32>
    %c0_2 = arith.constant 0 : index
    %c0_3 = arith.constant 0 : index
    %c0_4 = arith.constant 0 : index
    %4 = vector.load %arg4[%c0_2, %c0_3, %c0_4] : memref<1x1x32xf32, #tpu.memory_space<vmem>>, vector<1x1x32xf32>
    %5 = vector.shape_cast %4 : vector<1x1x32xf32> to vector<1x32xf32>
    %c0_5 = arith.constant 0 : index
    %c0_6 = arith.constant 0 : index
    %c0_7 = arith.constant 0 : index
    %6 = vector.load %arg5[%c0_5, %c0_6, %c0_7] : memref<1x1x32xf32, #tpu.memory_space<vmem>>, vector<1x1x32xf32>
    %7 = vector.shape_cast %6 : vector<1x1x32xf32> to vector<1x32xf32>
    %cst = arith.constant dense<0.000000e+00> : vector<17xf32>
    %8 = vector.multi_reduction <add>, %3, %cst [1] : vector<17x32xf32> to vector<17xf32>
    %9 = vector.shape_cast %8 : vector<17xf32> to vector<17x1xf32>
    %cst_8 = arith.constant 3.200000e+01 : f32
    %10 = vector.broadcast %cst_8 : f32 to vector<17x1xf32>
    %11 = arith.divf %9, %10 : vector<17x1xf32>
    %12 = vector.broadcast %11 : vector<17x1xf32> to vector<17x32xf32>
    %13 = arith.subf %3, %12 : vector<17x32xf32>
    %14 = arith.mulf %13, %13 : vector<17x32xf32>
    %cst_9 = arith.constant dense<0.000000e+00> : vector<17xf32>
    %15 = vector.multi_reduction <add>, %14, %cst_9 [1] : vector<17x32xf32> to vector<17xf32>
    %16 = vector.shape_cast %15 : vector<17xf32> to vector<17x1xf32>
    %cst_10 = arith.constant 3.200000e+01 : f32
    %17 = vector.broadcast %cst_10 : f32 to vector<17x1xf32>
    %18 = arith.divf %16, %17 : vector<17x1xf32>
    %19 = vector.broadcast %11 : vector<17x1xf32> to vector<17x32xf32>
    %20 = arith.subf %3, %19 : vector<17x32xf32>
    %cst_11 = arith.constant 9.99999974E-6 : f32
    %21 = vector.broadcast %cst_11 : f32 to vector<17x1xf32>
    %22 = arith.addf %18, %21 : vector<17x1xf32>
    %23 = math.rsqrt %22 : vector<17x1xf32>
    %24 = vector.broadcast %23 : vector<17x1xf32> to vector<17x32xf32>
    %25 = arith.mulf %20, %24 : vector<17x32xf32>
    %26 = vector.broadcast %5 : vector<1x32xf32> to vector<17x32xf32>
    %27 = arith.mulf %25, %26 : vector<17x32xf32>
    %28 = vector.broadcast %7 : vector<1x32xf32> to vector<17x32xf32>
    %29 = arith.addf %27, %28 : vector<17x32xf32>
    %30 = arith.truncf %29 : vector<17x32xf32> to vector<17x32xbf16>
    %c0_12 = arith.constant 0 : index
    %c0_13 = arith.constant 0 : index
    %c0_14 = arith.constant 0 : index
    %31 = vector.load %arg6[%c0_12, %c0_13, %c0_14] : memref<1x32x96xbf16, #tpu.memory_space<vmem>>, vector<1x32x96xbf16>
    %32 = vector.shape_cast %31 : vector<1x32x96xbf16> to vector<32x96xbf16>
    %cst_15 = arith.constant dense<0.000000e+00> : vector<17x96xf32>
    %33 = tpu.matmul %30, %32, %cst_15 {dimension_numbers = #tpu.dot_dimension_numbers<[1], [0], [0], [1], [0, 0, 1, 1], [], []>} : vector<17x32xbf16>, vector<32x96xbf16>, vector<17x96xf32> -> vector<17x96xf32>
    %c0_16 = arith.constant 0 : index
    %c0_17 = arith.constant 0 : index
    %c0_18 = arith.constant 0 : index
    %34 = vector.load %arg7[%c0_16, %c0_17, %c0_18] : memref<1x1x96xf32, #tpu.memory_space<vmem>>, vector<1x1x96xf32>
    %35 = vector.shape_cast %34 : vector<1x1x96xf32> to vector<1x96xf32>
    %36 = vector.broadcast %35 : vector<1x96xf32> to vector<17x96xf32>
    %37 = arith.addf %33, %36 : vector<17x96xf32>
    %38 = vector.extract_strided_slice %37 {offsets = [0, 0], sizes = [17, 32], strides = [1, 1]} : vector<17x96xf32> to vector<17x32xf32>
    %cst_19 = arith.constant 0.353553385 : f32
    %39 = vector.broadcast %cst_19 : f32 to vector<17x32xf32>
    %40 = arith.mulf %38, %39 : vector<17x32xf32>
    %41 = vector.extract_strided_slice %37 {offsets = [0, 32], sizes = [17, 32], strides = [1, 1]} : vector<17x96xf32> to vector<17x32xf32>
    %42 = vector.extract_strided_slice %37 {offsets = [0, 64], sizes = [17, 32], strides = [1, 1]} : vector<17x96xf32> to vector<17x32xf32>
    %43 = vector.extract_strided_slice %40 {offsets = [0, 0], sizes = [17, 8], strides = [1, 1]} : vector<17x32xf32> to vector<17x8xf32>
    %44 = vector.extract_strided_slice %40 {offsets = [0, 8], sizes = [17, 8], strides = [1, 1]} : vector<17x32xf32> to vector<17x8xf32>
    %45 = vector.extract_strided_slice %40 {offsets = [0, 16], sizes = [17, 8], strides = [1, 1]} : vector<17x32xf32> to vector<17x8xf32>
    %46 = vector.extract_strided_slice %40 {offsets = [0, 24], sizes = [17, 8], strides = [1, 1]} : vector<17x32xf32> to vector<17x8xf32>
    %47 = vector.shape_cast %43 : vector<17x8xf32> to vector<1x17x8xf32>
    %48 = vector.shape_cast %44 : vector<17x8xf32> to vector<1x17x8xf32>
    %49 = vector.shape_cast %45 : vector<17x8xf32> to vector<1x17x8xf32>
    %50 = vector.shape_cast %46 : vector<17x8xf32> to vector<1x17x8xf32>
    %51 = tpu.concatenate %47, %48, %49, %50 in 0 : vector<1x17x8xf32>, vector<1x17x8xf32>, vector<1x17x8xf32>, vector<1x17x8xf32> -> vector<4x17x8xf32>
    %52 = arith.truncf %51 : vector<4x17x8xf32> to vector<4x17x8xbf16>
    %53 = vector.extract_strided_slice %41 {offsets = [0, 0], sizes = [17, 8], strides = [1, 1]} : vector<17x32xf32> to vector<17x8xf32>
    %54 = vector.extract_strided_slice %41 {offsets = [0, 8], sizes = [17, 8], strides = [1, 1]} : vector<17x32xf32> to vector<17x8xf32>
    %55 = vector.extract_strided_slice %41 {offsets = [0, 16], sizes = [17, 8], strides = [1, 1]} : vector<17x32xf32> to vector<17x8xf32>
    %56 = vector.extract_strided_slice %41 {offsets = [0, 24], sizes = [17, 8], strides = [1, 1]} : vector<17x32xf32> to vector<17x8xf32>
    %57 = vector.shape_cast %53 : vector<17x8xf32> to vector<1x17x8xf32>
    %58 = vector.shape_cast %54 : vector<17x8xf32> to vector<1x17x8xf32>
    %59 = vector.shape_cast %55 : vector<17x8xf32> to vector<1x17x8xf32>
    %60 = vector.shape_cast %56 : vector<17x8xf32> to vector<1x17x8xf32>
    %61 = tpu.concatenate %57, %58, %59, %60 in 0 : vector<1x17x8xf32>, vector<1x17x8xf32>, vector<1x17x8xf32>, vector<1x17x8xf32> -> vector<4x17x8xf32>
    %62 = arith.truncf %61 : vector<4x17x8xf32> to vector<4x17x8xbf16>
    %63 = vector.extract_strided_slice %42 {offsets = [0, 0], sizes = [17, 8], strides = [1, 1]} : vector<17x32xf32> to vector<17x8xf32>
    %64 = vector.extract_strided_slice %42 {offsets = [0, 8], sizes = [17, 8], strides = [1, 1]} : vector<17x32xf32> to vector<17x8xf32>
    %65 = vector.extract_strided_slice %42 {offsets = [0, 16], sizes = [17, 8], strides = [1, 1]} : vector<17x32xf32> to vector<17x8xf32>
    %66 = vector.extract_strided_slice %42 {offsets = [0, 24], sizes = [17, 8], strides = [1, 1]} : vector<17x32xf32> to vector<17x8xf32>
    %67 = vector.shape_cast %63 : vector<17x8xf32> to vector<1x17x8xf32>
    %68 = vector.shape_cast %64 : vector<17x8xf32> to vector<1x17x8xf32>
    %69 = vector.shape_cast %65 : vector<17x8xf32> to vector<1x17x8xf32>
    %70 = vector.shape_cast %66 : vector<17x8xf32> to vector<1x17x8xf32>
    %71 = tpu.concatenate %67, %68, %69, %70 in 0 : vector<1x17x8xf32>, vector<1x17x8xf32>, vector<1x17x8xf32>, vector<1x17x8xf32> -> vector<4x17x8xf32>
    %72 = arith.truncf %71 : vector<4x17x8xf32> to vector<4x17x8xbf16>
    "tpu.trace_start"() <{level = 10 : i32, message = "hqd,hkd->hqk"}> : () -> ()
    %cst_20 = arith.constant dense<0.000000e+00> : vector<4x17x17xf32>
    %73 = tpu.matmul %52, %62, %cst_20 {dimension_numbers = #tpu.dot_dimension_numbers<[2], [2], [1], [1], [0, 0, 0, 1, 1, 1], [0], [0]>} : vector<4x17x8xbf16>, vector<4x17x8xbf16>, vector<4x17x17xf32> -> vector<4x17x17xf32>
    "tpu.trace_stop"() : () -> ()
    %cst_21 = arith.constant dense<0xFF800000> : vector<4x17xf32>
    %74 = vector.multi_reduction <maximumf>, %73, %cst_21 [2] : vector<4x17x17xf32> to vector<4x17xf32>
    %75 = vector.shape_cast %74 : vector<4x17xf32> to vector<4x17x1xf32>
    %76 = vector.broadcast %75 : vector<4x17x1xf32> to vector<4x17x17xf32>
    %77 = arith.subf %73, %76 : vector<4x17x17xf32>
    %78 = math.exp %77 : vector<4x17x17xf32>
    %cst_22 = arith.constant dense<0.000000e+00> : vector<4x17xf32>
    %79 = vector.multi_reduction <add>, %78, %cst_22 [2] : vector<4x17x17xf32> to vector<4x17xf32>
    %80 = vector.shape_cast %79 : vector<4x17xf32> to vector<4x17x1xf32>
    %81 = tpu.reciprocal %80 {approx = true} : vector<4x17x1xf32> -> vector<4x17x1xf32>
    %82 = vector.broadcast %81 : vector<4x17x1xf32> to vector<4x17x17xf32>
    %83 = arith.mulf %78, %82 : vector<4x17x17xf32>
    %84 = arith.truncf %83 : vector<4x17x17xf32> to vector<4x17x17xbf16>
    "tpu.trace_start"() <{level = 10 : i32, message = "hqk,hkd->hqd"}> : () -> ()
    %cst_23 = arith.constant dense<0.000000e+00> : vector<4x17x8xf32>
    %85 = tpu.matmul %84, %72, %cst_23 {dimension_numbers = #tpu.dot_dimension_numbers<[2], [1], [1], [2], [0, 0, 0, 1, 1, 2], [0], [0]>} : vector<4x17x17xbf16>, vector<4x17x8xbf16>, vector<4x17x8xf32> -> vector<4x17x8xf32>
    "tpu.trace_stop"() : () -> ()
    %86 = vector.extract_strided_slice %85 {offsets = [0, 0, 0], sizes = [1, 17, 8], strides = [1, 1, 1]} : vector<4x17x8xf32> to vector<1x17x8xf32>
    %87 = vector.shape_cast %86 : vector<1x17x8xf32> to vector<17x8xf32>
    %88 = vector.extract_strided_slice %85 {offsets = [1, 0, 0], sizes = [1, 17, 8], strides = [1, 1, 1]} : vector<4x17x8xf32> to vector<1x17x8xf32>
    %89 = vector.shape_cast %88 : vector<1x17x8xf32> to vector<17x8xf32>
    %90 = vector.extract_strided_slice %85 {offsets = [2, 0, 0], sizes = [1, 17, 8], strides = [1, 1, 1]} : vector<4x17x8xf32> to vector<1x17x8xf32>
    %91 = vector.shape_cast %90 : vector<1x17x8xf32> to vector<17x8xf32>
    %92 = vector.extract_strided_slice %85 {offsets = [3, 0, 0], sizes = [1, 17, 8], strides = [1, 1, 1]} : vector<4x17x8xf32> to vector<1x17x8xf32>
    %93 = vector.shape_cast %92 : vector<1x17x8xf32> to vector<17x8xf32>
    %94 = tpu.concatenate %87, %89, %91, %93 in 1 : vector<17x8xf32>, vector<17x8xf32>, vector<17x8xf32>, vector<17x8xf32> -> vector<17x32xf32>
    %95 = arith.truncf %94 : vector<17x32xf32> to vector<17x32xbf16>
    %c0_24 = arith.constant 0 : index
    %c0_25 = arith.constant 0 : index
    %c0_26 = arith.constant 0 : index
    %96 = vector.load %arg8[%c0_24, %c0_25, %c0_26] : memref<1x32x32xbf16, #tpu.memory_space<vmem>>, vector<1x32x32xbf16>
    %97 = vector.shape_cast %96 : vector<1x32x32xbf16> to vector<32x32xbf16>
    %cst_27 = arith.constant dense<0.000000e+00> : vector<17x32xf32>
    %98 = tpu.matmul %95, %97, %cst_27 {dimension_numbers = #tpu.dot_dimension_numbers<[1], [0], [0], [1], [0, 0, 1, 1], [], []>} : vector<17x32xbf16>, vector<32x32xbf16>, vector<17x32xf32> -> vector<17x32xf32>
    %c0_28 = arith.constant 0 : index
    %c0_29 = arith.constant 0 : index
    %c0_30 = arith.constant 0 : index
    %99 = vector.load %arg9[%c0_28, %c0_29, %c0_30] : memref<1x1x32xf32, #tpu.memory_space<vmem>>, vector<1x1x32xf32>
    %100 = vector.shape_cast %99 : vector<1x1x32xf32> to vector<1x32xf32>
    %101 = vector.broadcast %100 : vector<1x32xf32> to vector<17x32xf32>
    %102 = arith.addf %98, %101 : vector<17x32xf32>
    %103 = arith.addf %3, %102 : vector<17x32xf32>
    %c0_31 = arith.constant 0 : index
    %c0_32 = arith.constant 0 : index
    %c0_33 = arith.constant 0 : index
    %104 = vector.load %arg10[%c0_31, %c0_32, %c0_33] : memref<1x1x32xf32, #tpu.memory_space<vmem>>, vector<1x1x32xf32>
    %105 = vector.shape_cast %104 : vector<1x1x32xf32> to vector<1x32xf32>
    %c0_34 = arith.constant 0 : index
    %c0_35 = arith.constant 0 : index
    %c0_36 = arith.constant 0 : index
    %106 = vector.load %arg11[%c0_34, %c0_35, %c0_36] : memref<1x1x32xf32, #tpu.memory_space<vmem>>, vector<1x1x32xf32>
    %107 = vector.shape_cast %106 : vector<1x1x32xf32> to vector<1x32xf32>
    %cst_37 = arith.constant dense<0.000000e+00> : vector<17xf32>
    %108 = vector.multi_reduction <add>, %103, %cst_37 [1] : vector<17x32xf32> to vector<17xf32>
    %109 = vector.shape_cast %108 : vector<17xf32> to vector<17x1xf32>
    %cst_38 = arith.constant 3.200000e+01 : f32
    %110 = vector.broadcast %cst_38 : f32 to vector<17x1xf32>
    %111 = arith.divf %109, %110 : vector<17x1xf32>
    %112 = vector.broadcast %111 : vector<17x1xf32> to vector<17x32xf32>
    %113 = arith.subf %103, %112 : vector<17x32xf32>
    %114 = arith.mulf %113, %113 : vector<17x32xf32>
    %cst_39 = arith.constant dense<0.000000e+00> : vector<17xf32>
    %115 = vector.multi_reduction <add>, %114, %cst_39 [1] : vector<17x32xf32> to vector<17xf32>
    %116 = vector.shape_cast %115 : vector<17xf32> to vector<17x1xf32>
    %cst_40 = arith.constant 3.200000e+01 : f32
    %117 = vector.broadcast %cst_40 : f32 to vector<17x1xf32>
    %118 = arith.divf %116, %117 : vector<17x1xf32>
    %119 = vector.broadcast %111 : vector<17x1xf32> to vector<17x32xf32>
    %120 = arith.subf %103, %119 : vector<17x32xf32>
    %cst_41 = arith.constant 9.99999974E-6 : f32
    %121 = vector.broadcast %cst_41 : f32 to vector<17x1xf32>
    %122 = arith.addf %118, %121 : vector<17x1xf32>
    %123 = math.rsqrt %122 : vector<17x1xf32>
    %124 = vector.broadcast %123 : vector<17x1xf32> to vector<17x32xf32>
    %125 = arith.mulf %120, %124 : vector<17x32xf32>
    %126 = vector.broadcast %105 : vector<1x32xf32> to vector<17x32xf32>
    %127 = arith.mulf %125, %126 : vector<17x32xf32>
    %128 = vector.broadcast %107 : vector<1x32xf32> to vector<17x32xf32>
    %129 = arith.addf %127, %128 : vector<17x32xf32>
    %130 = arith.truncf %129 : vector<17x32xf32> to vector<17x32xbf16>
    %c0_42 = arith.constant 0 : index
    %c0_43 = arith.constant 0 : index
    %c0_44 = arith.constant 0 : index
    %131 = vector.load %arg12[%c0_42, %c0_43, %c0_44] : memref<1x32x64xbf16, #tpu.memory_space<vmem>>, vector<1x32x64xbf16>
    %132 = vector.shape_cast %131 : vector<1x32x64xbf16> to vector<32x64xbf16>
    %cst_45 = arith.constant dense<0.000000e+00> : vector<17x64xf32>
    %133 = tpu.matmul %130, %132, %cst_45 {dimension_numbers = #tpu.dot_dimension_numbers<[1], [0], [0], [1], [0, 0, 1, 1], [], []>} : vector<17x32xbf16>, vector<32x64xbf16>, vector<17x64xf32> -> vector<17x64xf32>
    %c0_46 = arith.constant 0 : index
    %c0_47 = arith.constant 0 : index
    %c0_48 = arith.constant 0 : index
    %134 = vector.load %arg13[%c0_46, %c0_47, %c0_48] : memref<1x1x64xf32, #tpu.memory_space<vmem>>, vector<1x1x64xf32>
    %135 = vector.shape_cast %134 : vector<1x1x64xf32> to vector<1x64xf32>
    %136 = vector.broadcast %135 : vector<1x64xf32> to vector<17x64xf32>
    %137 = arith.addf %133, %136 : vector<17x64xf32>
    %138 = arith.mulf %137, %137 : vector<17x64xf32>
    %139 = arith.mulf %137, %138 : vector<17x64xf32>
    %cst_49 = arith.constant 4.471500e-02 : f32
    %140 = vector.broadcast %cst_49 : f32 to vector<17x64xf32>
    %141 = arith.mulf %140, %139 : vector<17x64xf32>
    %142 = arith.addf %137, %141 : vector<17x64xf32>
    %cst_50 = arith.constant 0.797884583 : f32
    %143 = vector.broadcast %cst_50 : f32 to vector<17x64xf32>
    %144 = arith.mulf %143, %142 : vector<17x64xf32>
    %145 = math.tanh %144 : vector<17x64xf32>
    %cst_51 = arith.constant 1.000000e+00 : f32
    %146 = vector.broadcast %cst_51 : f32 to vector<17x64xf32>
    %147 = arith.addf %146, %145 : vector<17x64xf32>
    %cst_52 = arith.constant 5.000000e-01 : f32
    %148 = vector.broadcast %cst_52 : f32 to vector<17x64xf32>
    %149 = arith.mulf %148, %147 : vector<17x64xf32>
    %150 = arith.mulf %137, %149 : vector<17x64xf32>
    %151 = arith.truncf %150 : vector<17x64xf32> to vector<17x64xbf16>
    %c0_53 = arith.constant 0 : index
    %c0_54 = arith.constant 0 : index
    %c0_55 = arith.constant 0 : index
    %152 = vector.load %arg14[%c0_53, %c0_54, %c0_55] : memref<1x64x32xbf16, #tpu.memory_space<vmem>>, vector<1x64x32xbf16>
    %153 = vector.shape_cast %152 : vector<1x64x32xbf16> to vector<64x32xbf16>
    %cst_56 = arith.constant dense<0.000000e+00> : vector<17x32xf32>
    %154 = tpu.matmul %151, %153, %cst_56 {dimension_numbers = #tpu.dot_dimension_numbers<[1], [0], [0], [1], [0, 0, 1, 1], [], []>} : vector<17x64xbf16>, vector<64x32xbf16>, vector<17x32xf32> -> vector<17x32xf32>
    %c0_57 = arith.constant 0 : index
    %c0_58 = arith.constant 0 : index
    %c0_59 = arith.constant 0 : index
    %155 = vector.load %arg15[%c0_57, %c0_58, %c0_59] : memref<1x1x32xf32, #tpu.memory_space<vmem>>, vector<1x1x32xf32>
    %156 = vector.shape_cast %155 : vector<1x1x32xf32> to vector<1x32xf32>
    %157 = vector.broadcast %156 : vector<1x32xf32> to vector<17x32xf32>
    %158 = arith.addf %154, %157 : vector<17x32xf32>
    %159 = arith.addf %103, %158 : vector<17x32xf32>
    %c0_60 = arith.constant 0 : index
    %c0_61 = arith.constant 0 : index
    %160 = vector.load %arg21[%c0_60, %c0_61] : memref<17x32xf32, #tpu.memory_space<vmem>>, vector<17x32xf32>
    tpu.vector_store %arg21[%c0_60, %c0_61], %159 {strides = array<i32>} : memref<17x32xf32, #tpu.memory_space<vmem>>, vector<17x32xf32>,
    %c1_i32 = arith.constant 1 : i32
    %161 = arith.cmpi eq, %arg1, %c1_i32 : i32
    %162 = arith.extui %161 : i1 to i32
    %c0_i32_62 = arith.constant 0 : i32
    %163 = arith.cmpi ne, %162, %c0_i32_62 : i32
    scf.if %163 {
      %c0_63 = arith.constant 0 : index
      %c0_64 = arith.constant 0 : index
      %164 = vector.load %arg16[%c0_63, %c0_64] : memref<1x32xf32, #tpu.memory_space<vmem>>, vector<1x32xf32>
      %c0_65 = arith.constant 0 : index
      %c0_66 = arith.constant 0 : index
      %165 = vector.load %arg17[%c0_65, %c0_66] : memref<1x32xf32, #tpu.memory_space<vmem>>, vector<1x32xf32>
      %cst_67 = arith.constant dense<0.000000e+00> : vector<17xf32>
      %166 = vector.multi_reduction <add>, %159, %cst_67 [1] : vector<17x32xf32> to vector<17xf32>
      %167 = vector.shape_cast %166 : vector<17xf32> to vector<17x1xf32>
      %cst_68 = arith.constant 3.200000e+01 : f32
      %168 = vector.broadcast %cst_68 : f32 to vector<17x1xf32>
      %169 = arith.divf %167, %168 : vector<17x1xf32>
      %170 = vector.broadcast %169 : vector<17x1xf32> to vector<17x32xf32>
      %171 = arith.subf %159, %170 : vector<17x32xf32>
      %172 = arith.mulf %171, %171 : vector<17x32xf32>
      %cst_69 = arith.constant dense<0.000000e+00> : vector<17xf32>
      %173 = vector.multi_reduction <add>, %172, %cst_69 [1] : vector<17x32xf32> to vector<17xf32>
      %174 = vector.shape_cast %173 : vector<17xf32> to vector<17x1xf32>
      %cst_70 = arith.constant 3.200000e+01 : f32
      %175 = vector.broadcast %cst_70 : f32 to vector<17x1xf32>
      %176 = arith.divf %174, %175 : vector<17x1xf32>
      %177 = vector.broadcast %169 : vector<17x1xf32> to vector<17x32xf32>
      %178 = arith.subf %159, %177 : vector<17x32xf32>
      %cst_71 = arith.constant 9.99999974E-6 : f32
      %179 = vector.broadcast %cst_71 : f32 to vector<17x1xf32>
      %180 = arith.addf %176, %179 : vector<17x1xf32>
      %181 = math.rsqrt %180 : vector<17x1xf32>
      %182 = vector.broadcast %181 : vector<17x1xf32> to vector<17x32xf32>
      %183 = arith.mulf %178, %182 : vector<17x32xf32>
      %184 = vector.broadcast %164 : vector<1x32xf32> to vector<17x32xf32>
      %185 = arith.mulf %183, %184 : vector<17x32xf32>
      %186 = vector.broadcast %165 : vector<1x32xf32> to vector<17x32xf32>
      %187 = arith.addf %185, %186 : vector<17x32xf32>
      %188 = arith.truncf %187 : vector<17x32xf32> to vector<17x32xbf16>
      %c0_72 = arith.constant 0 : index
      %c0_73 = arith.constant 0 : index
      %189 = vector.load %arg18[%c0_72, %c0_73] : memref<32x128xbf16, #tpu.memory_space<vmem>>, vector<32x128xbf16>
      %cst_74 = arith.constant dense<0.000000e+00> : vector<17x128xf32>
      %190 = tpu.matmul %188, %189, %cst_74 {dimension_numbers = #tpu.dot_dimension_numbers<[1], [0], [0], [1], [0, 0, 1, 1], [], []>} : vector<17x32xbf16>, vector<32x128xbf16>, vector<17x128xf32> -> vector<17x128xf32>
      %c0_75 = arith.constant 0 : index
      %c0_76 = arith.constant 0 : index
      %191 = vector.load %arg19[%c0_75, %c0_76] : memref<1x128xf32, #tpu.memory_space<vmem>>, vector<1x128xf32>
      %192 = vector.broadcast %191 : vector<1x128xf32> to vector<17x128xf32>
      %193 = arith.addf %190, %192 : vector<17x128xf32>
      %c0_77 = arith.constant 0 : index
      %c0_78 = arith.constant 0 : index
      %c0_79 = arith.constant 0 : index
      %194 = vector.load %arg20[%c0_77, %c0_78, %c0_79] : memref<1x17x128xf32, #tpu.memory_space<vmem>>, vector<1x17x128xf32>
      %195 = vector.shape_cast %194 : vector<1x17x128xf32> to vector<17x128xf32>
      %196 = vector.shape_cast %193 : vector<17x128xf32> to vector<1x17x128xf32>
      tpu.vector_store %arg20[%c0_77, %c0_78, %c0_79], %196 {strides = array<i32>} : memref<1x17x128xf32, #tpu.memory_space<vmem>>, vector<1x17x128xf32>,
    } else {
    }
    return
  }
  func.func @transform_0(%arg0: i32, %arg1: i32) -> (i32, i32, i32) {
    %c0_i32 = arith.constant 0 : i32
    %c0_i32_0 = arith.constant 0 : i32
    %c0_i32_1 = arith.constant 0 : i32
    return %arg0, %c0_i32, %c0_i32_0 : i32, i32, i32
  }
  func.func @transform_1(%arg0: i32, %arg1: i32) -> (i32, i32, i32) {
    %c0_i32 = arith.constant 0 : i32
    %c0_i32_0 = arith.constant 0 : i32
    %c0_i32_1 = arith.constant 0 : i32
    %c0_i32_2 = arith.constant 0 : i32
    return %c0_i32, %c0_i32_0, %c0_i32_1 : i32, i32, i32
  }
  func.func @transform_2(%arg0: i32, %arg1: i32) -> (i32, i32, i32) {
    %c0_i32 = arith.constant 0 : i32
    %c0_i32_0 = arith.constant 0 : i32
    %c0_i32_1 = arith.constant 0 : i32
    return %arg1, %c0_i32, %c0_i32_0 : i32, i32, i32
  }
  func.func @transform_3(%arg0: i32, %arg1: i32) -> (i32, i32, i32) {
    %c0_i32 = arith.constant 0 : i32
    %c0_i32_0 = arith.constant 0 : i32
    %c0_i32_1 = arith.constant 0 : i32
    return %arg1, %c0_i32, %c0_i32_0 : i32, i32, i32
  }
  func.func @transform_4(%arg0: i32, %arg1: i32) -> (i32, i32, i32) {
    %c0_i32 = arith.constant 0 : i32
    %c0_i32_0 = arith.constant 0 : i32
    %c0_i32_1 = arith.constant 0 : i32
    return %arg1, %c0_i32, %c0_i32_0 : i32, i32, i32
  }
  func.func @transform_5(%arg0: i32, %arg1: i32) -> (i32, i32, i32) {
    %c0_i32 = arith.constant 0 : i32
    %c0_i32_0 = arith.constant 0 : i32
    %c0_i32_1 = arith.constant 0 : i32
    return %arg1, %c0_i32, %c0_i32_0 : i32, i32, i32
  }
  func.func @transform_6(%arg0: i32, %arg1: i32) -> (i32, i32, i32) {
    %c0_i32 = arith.constant 0 : i32
    %c0_i32_0 = arith.constant 0 : i32
    %c0_i32_1 = arith.constant 0 : i32
    return %arg1, %c0_i32, %c0_i32_0 : i32, i32, i32
  }
  func.func @transform_7(%arg0: i32, %arg1: i32) -> (i32, i32, i32) {
    %c0_i32 = arith.constant 0 : i32
    %c0_i32_0 = arith.constant 0 : i32
    %c0_i32_1 = arith.constant 0 : i32
    return %arg1, %c0_i32, %c0_i32_0 : i32, i32, i32
  }
  func.func @transform_8(%arg0: i32, %arg1: i32) -> (i32, i32, i32) {
    %c0_i32 = arith.constant 0 : i32
    %c0_i32_0 = arith.constant 0 : i32
    %c0_i32_1 = arith.constant 0 : i32
    return %arg1, %c0_i32, %c0_i32_0 : i32, i32, i32
  }
  func.func @transform_9(%arg0: i32, %arg1: i32) -> (i32, i32, i32) {
    %c0_i32 = arith.constant 0 : i32
    %c0_i32_0 = arith.constant 0 : i32
    %c0_i32_1 = arith.constant 0 : i32
    return %arg1, %c0_i32, %c0_i32_0 : i32, i32, i32
  }
  func.func @transform_10(%arg0: i32, %arg1: i32) -> (i32, i32, i32) {
    %c0_i32 = arith.constant 0 : i32
    %c0_i32_0 = arith.constant 0 : i32
    %c0_i32_1 = arith.constant 0 : i32
    return %arg1, %c0_i32, %c0_i32_0 : i32, i32, i32
  }
  func.func @transform_11(%arg0: i32, %arg1: i32) -> (i32, i32, i32) {
    %c0_i32 = arith.constant 0 : i32
    %c0_i32_0 = arith.constant 0 : i32
    %c0_i32_1 = arith.constant 0 : i32
    return %arg1, %c0_i32, %c0_i32_0 : i32, i32, i32
  }
  func.func @transform_12(%arg0: i32, %arg1: i32) -> (i32, i32, i32) {
    %c0_i32 = arith.constant 0 : i32
    %c0_i32_0 = arith.constant 0 : i32
    %c0_i32_1 = arith.constant 0 : i32
    return %arg1, %c0_i32, %c0_i32_0 : i32, i32, i32
  }
  func.func @transform_13(%arg0: i32, %arg1: i32) -> (i32, i32, i32) {
    %c0_i32 = arith.constant 0 : i32
    %c0_i32_0 = arith.constant 0 : i32
    %c0_i32_1 = arith.constant 0 : i32
    return %arg1, %c0_i32, %c0_i32_0 : i32, i32, i32
  }
  func.func @transform_14(%arg0: i32, %arg1: i32) -> (i32, i32) {
    %c0_i32 = arith.constant 0 : i32
    %c0_i32_0 = arith.constant 0 : i32
    %c0_i32_1 = arith.constant 0 : i32
    return %c0_i32, %c0_i32_0 : i32, i32
  }
  func.func @transform_15(%arg0: i32, %arg1: i32) -> (i32, i32) {
    %c0_i32 = arith.constant 0 : i32
    %c0_i32_0 = arith.constant 0 : i32
    %c0_i32_1 = arith.constant 0 : i32
    return %c0_i32, %c0_i32_0 : i32, i32
  }
  func.func @transform_16(%arg0: i32, %arg1: i32) -> (i32, i32) {
    %c0_i32 = arith.constant 0 : i32
    %c0_i32_0 = arith.constant 0 : i32
    %c0_i32_1 = arith.constant 0 : i32
    return %c0_i32, %c0_i32_0 : i32, i32
  }
  func.func @transform_17(%arg0: i32, %arg1: i32) -> (i32, i32) {
    %c0_i32 = arith.constant 0 : i32
    %c0_i32_0 = arith.constant 0 : i32
    %c0_i32_1 = arith.constant 0 : i32
    return %c0_i32, %c0_i32_0 : i32, i32
  }
  func.func @transform_18(%arg0: i32, %arg1: i32) -> (i32, i32, i32) {
    %c0_i32 = arith.constant 0 : i32
    %c0_i32_0 = arith.constant 0 : i32
    %c0_i32_1 = arith.constant 0 : i32
    return %arg0, %c0_i32, %c0_i32_0 : i32, i32, i32
  }
}

</mosaic_0001>

<bundles_post_ra>
// kernel: tpu_custom_call.1
= control target key start
LH: loop header
LB: loop body
LE: loop exit
PB: predicated region body
PF: predicated region fallthrough
CT: control target
= control target key end

     0   :  { %s2972_s27 = smov 0   ;;  %s2974_s28 = smov 0   ;;  %s3427_s0 = inlined_call_operand.vmem [shape: f32[2,17,32], index: 0, kind: input, shape index: {}]   ;;  %s3428_s1 = inlined_call_operand.vmem [shape: f32[1,17,32], index: 1, kind: input, shape index: {}]   ;;  %s3429_s2 = inlined_call_operand.vmem [shape: f32[2,1,32], index: 2, kind: input, shape index: {}]   ;;  %s3430_s3 = inlined_call_operand.vmem [shape: f32[2,1,32], index: 3, kind: input, shape index: {}]   ;;  %s3431_s4 = inlined_call_operand.vmem [shape: bf16[2,32,96], index: 4, kind: input, shape index: {}]   ;;  %s3432_s5 = inlined_call_operand.vmem [shape: f32[2,1,96], index: 5, kind: input, shape index: {}]   ;;  %s3433_s6 = inlined_call_operand.vmem [shape: bf16[2,32,32], index: 6, kind: input, shape index: {}]   ;;  %s3434_s7 = inlined_call_operand.vmem [shape: f32[2,1,32], index: 7, kind: input, shape index: {}]   ;;  %s3435_s8 = inlined_call_operand.vmem [shape: f32[2,1,32], index: 8, kind: input, shape index: {}]   ;;  %s3436_s9 = inlined_call_operand.vmem [shape: f32[2,1,32], index: 9, kind: input, shape index: {}]   ;;  %s3437_s10 = inlined_call_operand.vmem [shape: bf16[2,32,64], index: 10, kind: input, shape index: {}]   ;;  %s3438_s11 = inlined_call_operand.vmem [shape: f32[2,1,64], index: 11, kind: input, shape index: {}]   ;;  %s3439_s12 = inlined_call_operand.vmem [shape: bf16[2,64,32], index: 12, kind: input, shape index: {}]   ;;  %s3440_s13 = inlined_call_operand.vmem [shape: f32[2,1,32], index: 13, kind: input, shape index: {}]   ;;  %s3441_s14 = inlined_call_operand.vmem [shape: f32[1,32], index: 14, kind: input, shape index: {}]   ;;  %s3442_s15 = inlined_call_operand.vmem [shape: f32[1,32], index: 15, kind: input, shape index: {}]   ;;  %s3443_s16 = inlined_call_operand.vmem [shape: bf16[32,128], index: 16, kind: input, shape index: {}]   ;;  %s3444_s17 = inlined_call_operand.vmem [shape: f32[1,128], index: 17, kind: input, shape index: {}]   ;;  %s3445_s18 = inlined_call_operand.vmem [shape: f32[2,17,128], index: 18, kind: output, shape index: {}]  }
   0x1   :  { %3452 = sst [smem:[#allocation9_spill]] %s3427_s0  ;;  %s2976_s29 = smov 0  }
   0x2   :  { %3453 = sst [smem:[#allocation10_spill]] %s3428_s1  ;;  %s2978_s30 = smov 0  }
   0x3   :  { %3454 = sst [smem:[#allocation11_spill]] %s3429_s2  ;;  %s2980_s0 = smov 0  }
   0x4   :  { %3455 = sst [smem:[#allocation12_spill]] %s3431_s4 }
   0x5   :  { %3456 = sst [smem:[#allocation13_spill]] %s3433_s6 }
   0x6   :  { %3457 = sst [smem:[#allocation14_spill]] %s3441_s14 }
   0x7   :  { %3458 = sst [smem:[#allocation15_spill]] %s3442_s15 }
   0x8   :  { %3459 = sst [smem:[#allocation16_spill]] %s3443_s16 }
   0x9   :  { %3460 = sst [smem:[#allocation17_spill]] %s3444_s17 }
   0xa   :  { %3461 = sst [smem:[#allocation18_spill]] %s3445_s18 }
   0xb LB: > { %3462 = sst [smem:[#allocation3_spill]] %s2850_s27  ;;  %s37_s19 = sadd.s32 1, %s2858_s29  ;;  %s2866_s0 = sphi %s2980_s0, %s28_s0   ;;  %s2862_s30 = sphi %s2978_s30, %s3491_s30   ;;  %s2858_s29 = sphi %s2976_s29, %s3490_s29   ;;  %s2854_s28 = sphi %s2974_s28, %s3489_s28   ;;  %s2850_s27 = sphi %s2972_s27, %s3488_s27  }
   0xc   : > { %3463 = sst [smem:[#allocation4_spill]] %s2858_s29  ;;  %s40_s1 = sadd.s32 1, %s2862_s30 }
   0xd   : > { %3464 = sst [smem:[#allocation5_spill]] %s2862_s30  ;;  %p38_p0 = scmp.ge.s32.totalorder %s37_s19, 2 }
   0xe   : > { %3465 = sst [smem:[#allocation6_spill]] %s2866_s0  ;;  %p2411_p1 = scmp.ge.s32.totalorder %s2866_s0, 1 }
   0xf   : > { %p628_p2 = scmp.lt.s32.totalorder %s2866_s0, 5  ;;  %s3493_s19 = smov (%p38_p0, %s37_s19), 0 }
  0x10   : > { %3466 = sst [smem:[#allocation7_spill]] %s3493_s19  ;;  %s3495_s1 = smov (!%p38_p0, %s40_s1), %s2862_s30 }
  0x11   : > { %p629_p3 = pnand %p2411_p1, %p628_p2  ;;  %p42_p4 = scmp.ge.s32.totalorder %s3495_s1, 2 }
  0x12   : > { %p726_p5 = scmp.lt.s32.totalorder (!%p629_p3), %s2854_s28, 1  ;;  %p731_p6 = scmp.lt.s32.totalorder (!%p629_p3), %s2850_s27, 1 }
  0x13   : > { %s3497_s1 = smov (%p42_p4, %s3495_s1), 0  ;;  %632 = sbr.rel (%p629_p3) target bundleno = 3287 (0xcd7), region = 92 }
  0x14   : > { %3467 = sst [smem:[#allocation8_spill]] %s3497_s1  ;;  %s3469_s29 = sld [smem:[#allocation9_spill]] (!%p629_p3) }
  0x15   : > { %s3470_s4 = sld [smem:[#allocation12_spill]] (!%p629_p3)  ;;  %s3471_s6 = sld [smem:[#allocation13_spill]] (!%p629_p3) }
  0x16   : > { %s3472_s24 = sld [smem:[#allocation18_spill]] (!%p629_p3) }
  0x1a   : > { %s3499_s28 = smov (!%p726_p5, %s2854_s28), 1 }
  0x1b   : > { %s3006_s20 = scalar_select %p731_p6, %s2850_s27, 1 }
  0x1c   : > { %s2649_s21 = smul.u32 24, %s3499_s28 }
  0x1d   : > { %s2475_s17 = sshll.u32 %s3006_s20, 4  ;;  %s766_s18 = scalar_lea.vmem %s3438_s11, %s3006_s20 }
  0x1e   : > { %s730_s0 = scalar_lea.vmem %s3469_s29, %s2649_s21  ;;  %s3023_s16 = scalar_lea.vmem %s3470_s4, %s2475_s17 }
  0x1f   : > { %s3032_s23 = scalar_lea.vmem %s3471_s6, %s2475_s17  ;;  %s3049_s28 = scalar_lea.vmem %s3437_s10, %s2475_s17 }
  0x20   : > { %s2478_s6 = sshll.u32 %s3006_s20, 5  ;;  %s774_s30 = scalar_lea.vmem %s3440_s13, %s3006_s20 }
  0x21   : > { %s3063_s1 = scalar_lea.vmem %s3439_s12, %s2478_s6  ;;  %s3068_s4 = scalar_lea.vmem %s3472_s24, %s2649_s21 }
  0x22   : > { %s3473_s17 = sld [smem:[#allocation3_spill]] }
  0x28   : > { %p2422_p7 = scmp.ne.s32.totalorder %s3473_s17, 0 }
  0x29   : > { %v785_v0 = vld [vmem:[%s730_s0] sm:$0xff] (!%p2422_p7)  ;;  %s3474_s2 = sld [smem:[#allocation10_spill]] (!%p2422_p7)  ;;  %vm794_vm0 = vcmask (!%p2422_p7), 261120   ;;  %v786_v2 = vld [vmem:[%s730_s0 + $0x8] sm:$0xff] (!%p2422_p7)  ;;  %v787_v5 = vld [vmem:[%s730_s0 + $0x10] sm:$0x1] (!%p2422_p7) }
  0x2a   : > { %784 = sbr.rel (%p2422_p7) target bundleno = 52 (0x34), region = 96  ;;  %vm797_vm1 = vcmask (!%p2422_p7), 253952  }
  0x2f   : > { %v788_v1 = vld [vmem:[%s3474_s2] sm:$0xff] (!%p2422_p7)  ;;  %v789_v4 = vld [vmem:[%s3474_s2 + $0x8] sm:$0xff] (!%p2422_p7)  ;;  %v790_v6 = vld [vmem:[%s3474_s2 + $0x10] sm:$0x1] (!%p2422_p7) }
  0x30   : > { %v791_v3 = vadd.f32 (!%p2422_p7), %v788_v1, %v785_v0  ;;  %v792_v7 = vadd.f32 (!%p2422_p7), %v789_v4, %v786_v2  ;;  %v793_v8 = vadd.f32 (!%p2422_p7), %v790_v6, %v787_v5 }
  0x32   : > { %795 = vst.msk [vmem:[#allocation2] sm:$0xff] %vm794_vm0, %v791_v3  ;;  %796 = vst.msk [vmem:[#allocation2 + $0x8] sm:$0xff] %vm794_vm0, %v792_v7 }
  0x33   : > { %798 = vst.msk [vmem:[#allocation2 + $0x10] sm:$0x1] %vm797_vm1, %v793_v8 }
  0x34 PF: > { %vm804_vm2 = vcmask 261120   ;;  %vm811_vm3 = vcmask 253952   ;;  %v2744_v30 = vld [vmem:[%s3023_s16] sm:$0xff]   ;;  %v2745_v31 = vld [vmem:[%s3023_s16 + $0x8] sm:$0xff]   ;;  %s3475_s21 = sld [smem:[#allocation11_spill]]  ;;  %s3477_s15 = scalar_lea.vmem %s3430_s3, %s3006_s20  ;;  %vm1028_vm4 = vcmask 64512  }
  0x35   : > { %2533 = vmatprep.subr.bf16.mxu0 %v2744_v30  ;;  %v2424_v49 = vld [vmem:[%s3477_s15] ss:$0 sm:$0xff]  ;;  %s3478_s22 = scalar_lea.vmem %s3432_s5, %s3006_s20  ;;  %s2868_s25 = smov 120   ;;  %vm1294_vm5 = vcmask 131072   ;;  %vm1287_vm6 = vcmask 138240   ;;  %vm1440_vm7 = vcmask 1040384  }
  0x36   : > { %2534 = vmatpush3.bf16.msra.mxu0 %v2744_v30  ;;  %v2425_v57 = vld [vmem:[%s3478_s22] ss:$0 sm:$0xff]  ;;  %s2869_s26 = smov 112   ;;  %s2870_s6 = smov 104   ;;  %vm1719_vm8 = vcmask 130048   ;;  %vm1723_vm9 = vcmask 195584  }
  0x37   : > { %2535 = vmatprep.subr.bf16.mxu0 %v2745_v31  ;;  %s2871_s29 = smov 96   ;;  %s2872_s16 = smov 64   ;;  %vm2015_vm10 = vcmask 523264  }
  0x38   : > { %s2874_s0 = smov 8   ;;  %s3479_s14 = scalar_lea.vmem %s3434_s7, %s3006_s20 }
  0x39   : > { %v3080_v9 = vld [vmem:[#allocation2] sm:$0xff]  ;;  %v3084_v11 = vld [vmem:[#allocation2 + $0x8] sm:$0xff]  ;;  %s3480_s17 = scalar_lea.vmem %s3435_s8, %s3006_s20 }
  0x3a   : > { %v3082_v10 = vld [vmem:[#allocation2 + $0x10] sm:$0x1]  ;;  %v805_v12 = vsel %vm804_vm2, %v3080_v9, 0.0  ;;  %v808_v14 = vsel %vm804_vm2, %v3084_v11, 0.0  ;;  %2536 = vmatpush3.bf16.msra.mxu0 %v2745_v31  ;;  %s3476_s24 = scalar_lea.vmem %s3475_s21, %s3006_s20  ;;  %s2875_s21 = smov 16  }
  0x3b   : > { %v812_v13 = vsel %vm811_vm3, %v3082_v10, 0.0  ;;  %806 = vadd.xlane.f32.xlu0 %v805_v12  ;;  %v2423_v43 = vld [vmem:[%s3476_s24] ss:$0 sm:$0xff]  ;;  %s2876_s24 = smov 24  }
  0x3c   : > { %813 = vadd.xlane.f32.xlu1 %v812_v13 }
  0x3f   : > { %809 = vadd.xlane.f32.xlu0 %v808_v14 }
  0xc8   : > { %v807_v15 = vpop.xlane.xlu0 %806 }
  0xc9   : > { %v814_v16 = vpop.xlane.xlu1 %813  ;;  %v816_v17 = vmul.f32 0.03125, %v807_v15 }
  0xca   : > { %v818_v18 = vmul.f32 0.03125, %v814_v16 }
  0xcb   : > { %v819_v19 = vsub.f32 %v3080_v9, %v816_v17 }
  0xcc   : > { %v821_v20 = vsub.f32 %v3082_v10, %v818_v18  ;;  %v810_v21 = vpop.xlane.xlu0 %809 }
  0xcd   : > { %v817_v22 = vmul.f32 0.03125, %v810_v21  ;;  %v822_v23 = vmul.f32 %v819_v19, %v819_v19 }
  0xce   : > { %v824_v24 = vmul.f32 %v821_v20, %v821_v20 }
  0xcf   : > { %v820_v25 = vsub.f32 %v3084_v11, %v817_v22  ;;  %v825_v26 = vsel %vm804_vm2, %v822_v23, 0.0 }
  0xd0   : > { %826 = vadd.xlane.f32.xlu1 %v825_v26  ;;  %v831_v27 = vsel %vm811_vm3, %v824_v24, 0.0 }
  0xd1   : > { %v823_v28 = vmul.f32 %v820_v25, %v820_v25 }
  0xd3   : > { %v828_v29 = vsel %vm804_vm2, %v823_v28, 0.0 }
  0xd4   : > { %832 = vadd.xlane.f32.xlu1 %v831_v27  ;;  %829 = vadd.xlane.f32.xlu0 %v828_v29 }
 0x15d   : > { %v827_v32 = vpop.xlane.xlu1 %826 }
 0x15e   : > { %v834_v33 = vmul.f32 0.03125, %v827_v32 }
 0x160   : > { %v837_v34 = vadd.f32 1e-05, %v834_v33 }
 0x161   : > { %v833_v35 = vpop.xlane.xlu1 %832  ;;  %v830_v36 = vpop.xlane.xlu0 %829 }
 0x162   : > { %2754 = vrsqrt.f32 %v837_v34  ;;  %v836_v37 = vmul.f32 0.03125, %v833_v35  ;;  %v835_v38 = vmul.f32 0.03125, %v830_v36 }
 0x164   : > { %v839_v39 = vadd.f32 1e-05, %v836_v37  ;;  %v838_v40 = vadd.f32 1e-05, %v835_v38 }
 0x166   : > { %2756 = vrsqrt.f32 %v839_v39 }
 0x167   : > { %2758 = vrsqrt.f32 %v838_v40 }
 0x16c   : > { %v2755_v41 = vpop.eup %2754 }
 0x16d   : > { %v843_v42 = vmul.f32 %v2755_v41, %v819_v19 }
 0x16f   : > { %v852_v48 = vmul.f32 %v2423_v43, %v843_v42 }
 0x170   : > { %v2757_v44 = vpop.eup %2756 }
 0x171   : > { %v2759_v45 = vpop.eup %2758  ;;  %v845_v46 = vmul.f32 %v2757_v44, %v821_v20  ;;  %v861_v53 = vadd.f32 %v2424_v49, %v852_v48 }
 0x172   : > { %v844_v47 = vmul.f32 %v2759_v45, %v820_v25 }
 0x173   : > { %v854_v50 = vmul.f32 %v2423_v43, %v845_v46 }
 0x174   : > { %v853_v51 = vmul.f32 %v2423_v43, %v844_v47 }
 0x175   : > { %v863_v52 = vadd.f32 %v2424_v49, %v854_v50 }
 0x176   : > { %v862_v54 = vadd.f32 %v2424_v49, %v853_v51 }
 0x177   : > { %v865_v55 = vpack.c.bf16 %v863_v52, %v863_v52 }
 0x178   : > { %v864_v56 = vpack.c.bf16 %v862_v54, %v861_v53 }
 0x17a   : > { %2537 = vmatprep.mubr.msk.bf16.mxu0 %vm804_vm2, %v864_v56 }
 0x17b   : > { %2538 = vmatmul.mubr.msk.bf16.vlgmr.msra.gmra.mrb[0].mxu0 %vm804_vm2, %v865_v55 }
 0x24e   : > { %v2539_v58 = vpop.f32.mrb[0].mxu0 }
 0x24f   : > { %v938_v59 = vadd.f32 %v2539_v58, %v2425_v57  ;;  %v929_v60 = vpop.f32.mrb[1].mxu0 }
 0x250   : > { %v930_v61 = vadd.f32 %v2425_v57, %v929_v60  ;;  %v2540_v62 = vpop.f32.mrb[2].mxu0 }
 0x251   : > { %991 = vrot.lane.b32.xlu1 %v938_v59, %s2868_s25  ;;  %v932_v63 = vpop.f32.mrb[3].mxu0  ;;  %v3128_v7 = vpack.c.bf16 %v938_v59, %v938_v59  ;;  %v945_v28 = vmul.f32 0.35355338, %v938_v59 }
 0x252   : > { %v933_v0 = vadd.f32 %v2425_v57, %v932_v63  ;;  %v943_v1 = vmul.f32 0.35355338, %v930_v61 }
 0x253   : > { %v977_v38 = vpack.c.bf16 %v945_v28, %v945_v28 }
 0x254   : > { %v2704_v2 = vpack.i.bf16 %v933_v0, %v930_v61  ;;  %v944_v3 = vmul.f32 0.35355338, %v933_v0  ;;  %v3118_v4 = vpack.c.bf16 %v933_v0, %v930_v61 }
 0x256   : > { %2705 = vrot.lane.b32.xlu1 %v2704_v2, %s2869_s26  ;;  %2700 = vrot.lane.b32.xlu0 %v2704_v2, %s2868_s25  ;;  %v976_v5 = vpack.c.bf16 %v944_v3, %v943_v1  ;;  %v2714_v6 = vpack.i.bf16 %v944_v3, %v943_v1 }
 0x258   : > { %2545 = vmatprep.mubr.msk.bf16.mxu1 %vm1028_vm4, %v976_v5 }
 0x25a   : > { %2710 = vrot.lane.b32.xlu1 %v2704_v2, %s2870_s6  ;;  %1000 = vrot.lane.b32.xlu0 %v938_v59, %s2869_s26 }
 0x25e   : > { %1009 = vrot.lane.b32.xlu1 %v938_v59, %s2870_s6  ;;  %1024 = vrot.lane.b32.xlu0 %v3118_v4, %s2871_s29 }
 0x262   : > { %1026 = vrot.lane.b32.xlu0 %v3128_v7, %s2871_s29 }
 0x266   : > { %2715 = vrot.lane.b32.xlu0 %v2714_v6, %s2868_s25 }
 0x2c3   : > { %v992_v8 = vpop.permute.xlu1 %991 }
 0x2c4   : > { %v3141_v21 = vpack.c.bf16 %v992_v8, %v992_v8 }
 0x2c8   : > { %v2706_v12 = vpop.permute.xlu1 %2705  ;;  %v2701_v13 = vpop.permute.xlu0 %2700 }
 0x2c9   : > { %v2708_v14 = vunpack.i.h.bf16 %v2706_v12  ;;  %v2707_v15 = vunpack.i.l.bf16 %v2706_v12  ;;  %v2703_v16 = vunpack.i.h.bf16 %v2701_v13  ;;  %v2702_v17 = vunpack.i.l.bf16 %v2701_v13 }
 0x2cb   : > { %v3133_v18 = vpack.c.bf16 %v2708_v14, %v2707_v15  ;;  %v3135_v19 = vpack.c.bf16 %v2703_v16, %v2702_v17 }
 0x2cc   : > { %v1001_v20 = vpop.permute.xlu0 %1000  ;;  %v2711_v22 = vpop.permute.xlu1 %2710 }
 0x2cd   : > { %1091 = vrot.lane.b32.xlu1 %v3135_v19, %s2871_s29  ;;  %1157 = vrot.lane.b32.xlu0 %v3133_v18, %s2871_s29  ;;  %v3143_v23 = vpack.c.bf16 %v1001_v20, %v1001_v20  ;;  %v2713_v26 = vunpack.i.h.bf16 %v2711_v22  ;;  %v2712_v27 = vunpack.i.l.bf16 %v2711_v22 }
 0x2cf   : > { %v3154_v30 = vpack.c.bf16 %v2713_v26, %v2712_v27 }
 0x2d0   : > { %v1025_v24 = vpop.permute.xlu0 %1024  ;;  %v1010_v31 = vpop.permute.xlu1 %1009 }
 0x2d1   : > { %1093 = vrot.lane.b32.xlu1 %v3141_v21, %s2871_s29  ;;  %2641 = vmatprep.subr.msk.bf16.mxu1 %vm1028_vm4, %v1025_v24  ;;  %v1036_v25 = vsel %vm1028_vm4, %v1025_v24, 0  ;;  %v3160_v36 = vpack.c.bf16 %v1010_v31, %v1010_v31 }
 0x2d2   : > { %1159 = vrot.lane.b32.xlu0 %v3143_v23, %s2871_s29  ;;  %2542 = vmatpush3.bf16.xpose.msra.mxu1 %v1036_v25 }
 0x2d4   : > { %v1027_v29 = vpop.permute.xlu0 %1026 }
 0x2d5   : > { %953 = vrot.lane.b32.xlu1 %v945_v28, %s2868_s25  ;;  %2642 = vmatprep.subr.msk.bf16.mxu1 %vm1028_vm4, %v1027_v29  ;;  %v1039_v35 = vsel %vm1028_vm4, %v1027_v29, 0  ;;  %s3481_s25 = scalar_lea.vmem %s3436_s9, %s3006_s20  ;;  %s3482_s20 = sld [smem:[#allocation3_spill]] }
 0x2d6   : > { %2720 = vrot.lane.b32.xlu0 %v2714_v6, %s2869_s26 }
 0x2d8   : > { %v2716_v32 = vpop.permute.xlu0 %2715 }
 0x2d9   : > { %v2718_v33 = vunpack.i.h.bf16 %v2716_v32  ;;  %v2717_v34 = vunpack.i.l.bf16 %v2716_v32  ;;  %1223 = vrot.lane.b32.xlu1 %v3154_v30, %s2871_s29 }
 0x2da   : > { %2725 = vrot.lane.b32.xlu0 %v2714_v6, %s2870_s6  ;;  %2544 = vmatpush3.bf16.xpose.msra.mxu1 %v1039_v35 }
 0x2db   : > { %v978_v37 = vpack.c.bf16 %v2718_v33, %v2717_v34  ;;  %p2465_p8 = scmp.ne.s32.totalorder %s3482_s20, 1 }
 0x2dc   : > { %s3484_s19 = sld [smem:[#allocation14_spill]] (!%p2465_p8)  ;;  %s3485_s15 = sld [smem:[#allocation15_spill]] (!%p2465_p8) }
 0x2dd   : > { %1225 = vrot.lane.b32.xlu1 %v3160_v36, %s2871_s29  ;;  %2553 = vmatprep.mubr.msk.bf16.mxu0 %vm1028_vm4, %v978_v37  ;;  %s3486_s22 = sld [smem:[#allocation17_spill]] (!%p2465_p8) }
 0x2e1   : > { %962 = vrot.lane.b32.xlu1 %v945_v28, %s2869_s26  ;;  %2546 = vmatmul.mubr.msk.bf16.vlgmr.msra.gmra.mrb[0].mxu1 %vm1028_vm4, %v977_v38 }
 0x2e5   : > { %971 = vrot.lane.b32.xlu1 %v945_v28, %s2870_s6 }
 0x33f   : > { %v1092_v39 = vpop.permute.xlu1 %1091  ;;  %v1158_v40 = vpop.permute.xlu0 %1157 }
 0x340   : > { %v1102_v41 = vsel %vm1028_vm4, %v1092_v39, 0  ;;  %v1168_v42 = vsel %vm1028_vm4, %v1158_v40, 0  ;;  %2643 = vmatprep.subr.msk.bf16.mxu0 %vm1028_vm4, %v1092_v39  ;;  %2645 = vmatprep.subr.msk.bf16.mxu1 %vm1028_vm4, %v1158_v40 }
 0x341   : > { %2550 = vmatpush3.bf16.xpose.msra.mxu0 %v1102_v41  ;;  %2558 = vmatpush3.bf16.xpose.msra.mxu1 %v1168_v42 }
 0x343   : > { %v1094_v43 = vpop.permute.xlu1 %1093 }
 0x344   : > { %v1160_v44 = vpop.permute.xlu0 %1159  ;;  %2644 = vmatprep.subr.msk.bf16.mxu0 %vm1028_vm4, %v1094_v43  ;;  %v1105_v46 = vsel %vm1028_vm4, %v1094_v43, 0 }
 0x345   : > { %2646 = vmatprep.subr.msk.bf16.mxu1 %vm1028_vm4, %v1160_v44  ;;  %v1171_v47 = vsel %vm1028_vm4, %v1160_v44, 0 }
 0x347   : > { %v954_v45 = vpop.permute.xlu1 %953 }
 0x348   : > { %v2721_v48 = vpop.permute.xlu0 %2720  ;;  %v979_v56 = vpack.c.bf16 %v954_v45, %v954_v45 }
 0x349   : > { %v2723_v49 = vunpack.i.h.bf16 %v2721_v48  ;;  %v2722_v50 = vunpack.i.l.bf16 %v2721_v48  ;;  %2552 = vmatpush3.bf16.xpose.msra.mxu0 %v1105_v46  ;;  %2560 = vmatpush3.bf16.xpose.msra.mxu1 %v1171_v47 }
 0x34b   : > { %v980_v51 = vpack.c.bf16 %v2723_v49, %v2722_v50  ;;  %v1224_v52 = vpop.permute.xlu1 %1223 }
 0x34c   : > { %v2726_v53 = vpop.permute.xlu0 %2725  ;;  %2647 = vmatprep.subr.msk.bf16.mxu0 %vm1028_vm4, %v1224_v52  ;;  %v1234_v59 = vsel %vm1028_vm4, %v1224_v52, 0 }
 0x34d   : > { %v2728_v54 = vunpack.i.h.bf16 %v2726_v53  ;;  %v2727_v55 = vunpack.i.l.bf16 %v2726_v53  ;;  %2561 = vmatprep.mubr.msk.bf16.mxu1 %vm1028_vm4, %v980_v51 }
 0x34f   : > { %v982_v57 = vpack.c.bf16 %v2728_v54, %v2727_v55  ;;  %v1226_v58 = vpop.permute.xlu1 %1225 }
 0x350   : > { %2554 = vmatmul.mubr.msk.bf16.vlgmr.msra.gmra.mrb[4].mxu0 %vm1028_vm4, %v979_v56  ;;  %v1237_v62 = vsel %vm1028_vm4, %v1226_v58, 0 }
 0x351   : > { %2566 = vmatpush3.bf16.xpose.msra.mxu0 %v1234_v59  ;;  %2569 = vmatprep.mubr.msk.bf16.mxu0 %vm1028_vm4, %v982_v57 }
 0x352   : > { %2648 = vmatprep.subr.msk.bf16.mxu0 %vm1028_vm4, %v1226_v58 }
 0x353   : > { %v963_v60 = vpop.permute.xlu1 %962 }
 0x354   : > { %v981_v61 = vpack.c.bf16 %v963_v60, %v963_v60 }
 0x356   : > { %2562 = vmatmul.mubr.msk.bf16.vlgmr.msra.gmra.mrb[4].mxu1 %vm1028_vm4, %v981_v61 }
 0x357   : > { %v972_v63 = vpop.permute.xlu1 %971 }
 0x358   : > { %v983_v0 = vpack.c.bf16 %v972_v63, %v972_v63 }
 0x359   : > { %2568 = vmatpush3.bf16.xpose.msra.mxu0 %v1237_v62 }
 0x360   : > { %2570 = vmatmul.mubr.msk.bf16.vlgmr.msra.gmra.mrb[8].mxu0 %vm1028_vm4, %v983_v0 }
 0x3b4   : > { %v2547_v1 = vpop.f32.mrb[0].mxu1 }
 0x3b5   : > { %v1075_v2 = vpop.f32.mrb[1].mxu1  ;;  %v1295_v3 = vsel %vm1294_vm5, %v2547_v1, -inf }
 0x3b6   : > { %1296 = vmax.xlane.f32.xlu0 %v1295_v3  ;;  %v2548_v5 = vpop.f32.mrb[2].mxu1  ;;  %v1288_v12 = vsel %vm1287_vm6, %v1075_v2, -inf }
 0x3b7   : > { %v1078_v6 = vpop.f32.mrb[3].mxu1 }
 0x3b8   : > { %v1291_v8 = vsel %vm1287_vm6, %v1078_v6, -inf }
 0x3b9   : > { %1292 = vmax.xlane.f32.xlu1 %v1291_v8 }
 0x3ba   : > { %1289 = vmax.xlane.f32.xlu0 %v1288_v12 }
 0x423   : > { %v2555_v13 = vpop.f32.mrb[4].mxu0 }
 0x424   : > { %v1141_v14 = vpop.f32.mrb[5].mxu0  ;;  %v1304_v15 = vsel %vm1294_vm5, %v2555_v13, -inf }
 0x425   : > { %v2556_v16 = vpop.f32.mrb[6].mxu0  ;;  %1305 = vmax.xlane.f32.xlu1 %v1304_v15  ;;  %v1298_v17 = vsel %vm1287_vm6, %v1141_v14, -inf }
 0x426   : > { %v3190_v20 = vpop.f32.mrb[7].mxu0  ;;  %1299 = vmax.xlane.f32.xlu0 %v1298_v17 }
 0x427   : > { %v1301_v29 = vsel %vm1287_vm6, %v3190_v20, -inf }
 0x429   : > { %v3192_v22 = vpop.f32.mrb[4].mxu1 }
 0x42a   : > { %v3194_v24 = vpop.f32.mrb[5].mxu1  ;;  %v1313_v32 = vsel %vm1294_vm5, %v3192_v22, -inf }
 0x42b   : > { %v2564_v25 = vpop.f32.mrb[6].mxu1  ;;  %v1307_v26 = vsel %vm1287_vm6, %v3194_v24, -inf }
 0x42c   : > { %1308 = vmax.xlane.f32.xlu0 %v1307_v26  ;;  %v1210_v27 = vpop.f32.mrb[7].mxu1 }
 0x42d   : > { %v1310_v28 = vsel %vm1287_vm6, %v1210_v27, -inf }
 0x42e   : > { %1311 = vmax.xlane.f32.xlu1 %v1310_v28 }
 0x430   : > { %1302 = vmax.xlane.f32.xlu0 %v1301_v29  ;;  %v2873_v29 = vmov 0  }
 0x433   : > { %v3201_v31 = vpop.f32.mrb[8].mxu0 }
 0x434   : > { %v3205_v33 = vpop.f32.mrb[9].mxu0  ;;  %1314 = vmax.xlane.f32.xlu0 %v1313_v32  ;;  %v1322_v39 = vsel %vm1294_vm5, %v3201_v31, -inf }
 0x435   : > { %v2572_v34 = vpop.f32.mrb[10].mxu0  ;;  %v1316_v35 = vsel %vm1287_vm6, %v3205_v33, -inf }
 0x436   : > { %v3209_v37 = vpop.f32.mrb[11].mxu0  ;;  %1317 = vmax.xlane.f32.xlu1 %v1316_v35 }
 0x437   : > { %v1319_v38 = vsel %vm1287_vm6, %v3209_v37, -inf }
 0x438   : > { %1320 = vmax.xlane.f32.xlu0 %v1319_v38 }
 0x43a   : > { %1323 = vmax.xlane.f32.xlu1 %v1322_v39 }
 0x443   : > { %v1297_v40 = vpop.xlane.xlu0 %1296 }
 0x444   : > { %v1327_v41 = vsub.f32 %v2547_v1, %v1297_v40 }
 0x446   : > { %v1341_v43 = vmul.f32 1.442695, %v1327_v41  ;;  %v1293_v44 = vpop.xlane.xlu1 %1292 }
 0x447   : > { %v1290_v42 = vpop.xlane.xlu0 %1289  ;;  %v1326_v45 = vsub.f32 %v1078_v6, %v1293_v44 }
 0x448   : > { %2760 = vpow2.f32 %v1341_v43 }
 0x44b   : > { %1494 = vrot.lane.b32.xlu1 %v3135_v19, %s2872_s16  ;;  %v1325_v19 = vsub.f32 %v1075_v2, %v1290_v42 }
 0x44e   : > { %1429 = vrot.lane.b32.xlu0 %v3118_v4, %s2872_s16  ;;  %v1337_v4 = vmul.f32 1.442695, %v1325_v19 }
 0x44f   : > { %1431 = vrot.lane.b32.xlu1 %v3128_v7, %s2872_s16  ;;  %v1339_v7 = vmul.f32 1.442695, %v1326_v45 }
 0x450   : > { %2762 = vpow2.f32 %v1337_v4 }
 0x451   : > { %2764 = vpow2.f32 %v1339_v7 }
 0x452   : > { %1556 = vrot.lane.b32.xlu0 %v3133_v18, %s2872_s16  ;;  %v3227_v46 = vpop.eup %2760 }
 0x453   : > { %1496 = vrot.lane.b32.xlu1 %v3141_v21, %s2872_s16  ;;  %v1367_v18 = vsel %vm1294_vm5, %v3227_v46, 0.0 }
 0x457   : > { %1618 = vrot.lane.b32.xlu1 %v3154_v30, %s2872_s16 }
 0x45a   : > { %v3231_v21 = vpop.eup %2762 }
 0x45b   : > { %v1361_v30 = vsel %vm1287_vm6, %v3231_v21, 0.0  ;;  %v3235_v47 = vpop.eup %2764 }
 0x45c   : > { %v1364_v48 = vsel %vm1287_vm6, %v3235_v47, 0.0 }
 0x471   : > { %1368 = vadd.xlane.f32.xlu0 %v1367_v18 }
 0x475   : > { %1362 = vadd.xlane.f32.xlu0 %v1361_v30 }
 0x47b   : > { %1365 = vadd.xlane.f32.xlu1 %v1364_v48 }
 0x4b2   : > { %v1306_v49 = vpop.xlane.xlu1 %1305 }
 0x4b3   : > { %v1330_v50 = vsub.f32 %v2555_v13, %v1306_v49  ;;  %v1300_v51 = vpop.xlane.xlu0 %1299 }
 0x4b4   : > { %v1328_v52 = vsub.f32 %v1141_v14, %v1300_v51 }
 0x4b5   : > { %v1347_v53 = vmul.f32 1.442695, %v1330_v50 }
 0x4b6   : > { %v1343_v54 = vmul.f32 1.442695, %v1328_v52 }
 0x4b7   : > { %2766 = vpow2.f32 %v1347_v53 }
 0x4b8   : > { %2768 = vpow2.f32 %v1343_v54 }
 0x4b9   : > { %v1309_v55 = vpop.xlane.xlu0 %1308 }
 0x4ba   : > { %v1331_v60 = vsub.f32 %v3194_v24, %v1309_v55 }
 0x4bb   : > { %v1312_v56 = vpop.xlane.xlu1 %1311 }
 0x4bc   : > { %v1332_v57 = vsub.f32 %v1210_v27, %v1312_v56  ;;  %v1349_v5 = vmul.f32 1.442695, %v1331_v60 }
 0x4bd   : > { %v1303_v58 = vpop.xlane.xlu0 %1302 }
 0x4be   : > { %v1351_v59 = vmul.f32 1.442695, %v1332_v57  ;;  %v1329_v2 = vsub.f32 %v3190_v20, %v1303_v58 }
 0x4c0   : > { %2770 = vpow2.f32 %v1351_v59  ;;  %v1345_v14 = vmul.f32 1.442695, %v1329_v2 }
 0x4c1   : > { %v3240_v61 = vpop.eup %2766  ;;  %v1315_v62 = vpop.xlane.xlu0 %1314 }
 0x4c2   : > { %v1333_v63 = vsub.f32 %v3192_v22, %v1315_v62  ;;  %v1376_v0 = vsel %vm1294_vm5, %v3240_v61, 0.0  ;;  %v3245_v1 = vpop.eup %2768 }
 0x4c3   : > { %1377 = vadd.xlane.f32.xlu1 %v1376_v0  ;;  %v1318_v3 = vpop.xlane.xlu1 %1317  ;;  %v1370_v13 = vsel %vm1287_vm6, %v3245_v1, 0.0 }
 0x4c4   : > { %v1353_v6 = vmul.f32 1.442695, %v1333_v63  ;;  %v1334_v12 = vsub.f32 %v3205_v33, %v1318_v3 }
 0x4c5   : > { %v1321_v8 = vpop.xlane.xlu0 %1320 }
 0x4c6   : > { %2772 = vpow2.f32 %v1353_v6  ;;  %v1335_v16 = vsub.f32 %v3209_v37, %v1321_v8  ;;  %v1355_v24 = vmul.f32 1.442695, %v1334_v12 }
 0x4c7   : > { %1371 = vadd.xlane.f32.xlu1 %v1370_v13  ;;  %v1324_v15 = vpop.xlane.xlu1 %1323  ;;  %2774 = vpow2.f32 %v1349_v5 }
 0x4c8   : > { %v1336_v17 = vsub.f32 %v3201_v31, %v1324_v15  ;;  %2776 = vpow2.f32 %v1345_v14  ;;  %v1357_v28 = vmul.f32 1.442695, %v1335_v16  ;;  %v3257_v31 = vsel %vm1440_vm7, 65535, %v2873_v29 }
 0x4c9   : > { %v1430_v20 = vpop.permute.xlu0 %1429 }
 0x4ca   : > { %v3253_v22 = vpop.eup %2770  ;;  %v1359_v25 = vmul.f32 1.442695, %v1336_v17  ;;  %2573 = vmatprep.subr.bf16.mxu1 %v1430_v20 }
 0x4cb   : > { %2574 = vmatpush3.bf16.msra.mxu1 %v1430_v20  ;;  %v1495_v26 = vpop.permute.xlu1 %1494  ;;  %v1382_v27 = vsel %vm1287_vm6, %v3253_v22, 0.0 }
 0x4cc   : > { %2778 = vpow2.f32 %v1359_v25  ;;  %1383 = vadd.xlane.f32.xlu1 %v1382_v27  ;;  %2581 = vmatprep.subr.bf16.mxu0 %v1495_v26 }
 0x4cd   : > { %2582 = vmatpush3.bf16.msra.mxu0 %v1495_v26  ;;  %2780 = vpow2.f32 %v1355_v24  ;;  %v1557_v38 = vpop.permute.xlu0 %1556 }
 0x4ce   : > { %2782 = vpow2.f32 %v1357_v28 }
 0x4cf   : > { %v1432_v32 = vpop.permute.xlu1 %1431 }
 0x4d0   : > { %v3259_v33 = vpop.eup %2772  ;;  %v1444_v34 = vand.u32 %v3257_v31, %v1432_v32 }
 0x4d1   : > { %v1385_v35 = vsel %vm1294_vm5, %v3259_v33, 0.0  ;;  %v3264_v37 = vpop.eup %2774 }
 0x4d2   : > { %1386 = vadd.xlane.f32.xlu0 %v1385_v35  ;;  %2575 = vmatprep.subr.bf16.mxu1 %v1444_v34  ;;  %v3267_v41 = vpop.eup %2776  ;;  %v1379_v42 = vsel %vm1287_vm6, %v3264_v37, 0.0 }
 0x4d3   : > { %2576 = vmatpush3.bf16.msra.mxu1 %v1444_v34  ;;  %v1497_v39 = vpop.permute.xlu1 %1496  ;;  %v1373_v45 = vsel %vm1287_vm6, %v3267_v41, 0.0 }
 0x4d4   : > { %v1506_v40 = vand.u32 %v1497_v39, %v3257_v31  ;;  %2589 = vmatprep.subr.bf16.mxu1 %v1557_v38 }
 0x4d6   : > { %v3271_v43 = vpop.eup %2778  ;;  %1380 = vadd.xlane.f32.xlu0 %v1379_v42  ;;  %2583 = vmatprep.subr.bf16.mxu0 %v1506_v40 }
 0x4d7   : > { %2584 = vmatpush3.bf16.msra.mxu0 %v1506_v40  ;;  %v3273_v19 = vpop.permute.xlu1 %1618  ;;  %v1394_v44 = vsel %vm1294_vm5, %v3271_v43, 0.0  ;;  %v3277_v4 = vpop.eup %2780 }
 0x4d8   : > { %1395 = vadd.xlane.f32.xlu1 %v1394_v44  ;;  %2597 = vmatprep.subr.bf16.mxu0 %v3273_v19  ;;  %v3282_v7 = vpop.eup %2782  ;;  %v1388_v18 = vsel %vm1287_vm6, %v3277_v4, 0.0  ;;  %v2746_v44 = vld [vmem:[%s3032_s23] sm:$0xff]  }
 0x4d9   : > { %v1391_v30 = vsel %vm1287_vm6, %v3282_v7, 0.0 }
 0x4da   : > { %1374 = vadd.xlane.f32.xlu0 %v1373_v45 }
 0x4dc   : > { %1389 = vadd.xlane.f32.xlu1 %v1388_v18 }
 0x4de   : > { %1392 = vadd.xlane.f32.xlu0 %v1391_v30 }
 0x4ed   : > { %1620 = vrot.lane.b32.xlu1 %v3160_v36, %s2872_s16 }
 0x4f4   : > { %1558 = vrot.lane.b32.xlu0 %v3143_v23, %s2872_s16  ;;  %s3483_s16 = sld [smem:[#allocation16_spill]] (!%p2465_p8) }
 0x4fe   : > { %v1369_v48 = vpop.xlane.xlu0 %1368 }
 0x4ff   : > { %2784 = vrcp.f32 %v1369_v48  ;;  %v2747_v48 = vld [vmem:[%s3032_s23 + $0x8] sm:$0xff]  }
 0x502   : > { %v1363_v49 = vpop.xlane.xlu0 %1362 }
 0x503   : > { %2786 = vrcp.f32 %v1363_v49 }
 0x508   : > { %v1366_v50 = vpop.xlane.xlu1 %1365 }
 0x509   : > { %2788 = vrcp.f32 %v1366_v50  ;;  %v2785_v51 = vpop.eup %2784 }
 0x50a   : > { %v1411_v54 = vmul.f32 %v2785_v51, %v3227_v46 }
 0x50c   : > { %v1422_v36 = vpack.c.bf16 %v1411_v54, %v1411_v54 }
 0x50d   : > { %v2787_v52 = vpop.eup %2786 }
 0x50e   : > { %v1409_v55 = vmul.f32 %v2787_v52, %v3231_v21 }
 0x513   : > { %v2789_v53 = vpop.eup %2788 }
 0x514   : > { %v1410_v56 = vmul.f32 %v2789_v53, %v3235_v47 }
 0x516   : > { %v1421_v57 = vpack.c.bf16 %v1410_v56, %v1409_v55 }
 0x518   : > { %2577 = vmatprep.mubr.msk.bf16.mxu1 %vm1287_vm6, %v1421_v57 }
 0x519   : > { %2578 = vmatmul.mubr.msk.bf16.vlgmr.msra.gmra.mrb[8].mxu1 %vm1287_vm6, %v1422_v36 }
 0x51a   : > { %2590 = vmatpush3.bf16.msra.mxu1 %v1557_v38 }
 0x550   : > { %v1378_v23 = vpop.xlane.xlu1 %1377 }
 0x554   : > { %v1372_v58 = vpop.xlane.xlu1 %1371 }
 0x559   : > { %v1384_v59 = vpop.xlane.xlu1 %1383 }
 0x55a   : > { %2790 = vrcp.f32 %v1384_v59 }
 0x55f   : > { %v1387_v60 = vpop.xlane.xlu0 %1386 }
 0x560   : > { %2792 = vrcp.f32 %v1387_v60 }
 0x563   : > { %v1381_v62 = vpop.xlane.xlu0 %1380 }
 0x564   : > { %2794 = vrcp.f32 %v1381_v62  ;;  %v2791_v0 = vpop.eup %2790 }
 0x565   : > { %2796 = vrcp.f32 %v1378_v23  ;;  %v1396_v46 = vpop.xlane.xlu1 %1395  ;;  %v1416_v12 = vmul.f32 %v2791_v0, %v3253_v22 }
 0x566   : > { %2798 = vrcp.f32 %v1372_v58 }
 0x567   : > { %v1375_v21 = vpop.xlane.xlu0 %1374 }
 0x568   : > { %2800 = vrcp.f32 %v1375_v21 }
 0x569   : > { %v1390_v47 = vpop.xlane.xlu1 %1389 }
 0x56a   : > { %2802 = vrcp.f32 %v1390_v47  ;;  %v2793_v2 = vpop.eup %2792 }
 0x56b   : > { %v1393_v63 = vpop.xlane.xlu0 %1392  ;;  %v1417_v14 = vmul.f32 %v2793_v2, %v3259_v33 }
 0x56c   : > { %2804 = vrcp.f32 %v1393_v63 }
 0x56d   : > { %2806 = vrcp.f32 %v1396_v46  ;;  %v1426_v27 = vpack.c.bf16 %v1417_v14, %v1417_v14  ;;  %v1621_v22 = vpop.permute.xlu1 %1620 }
 0x56e   : > { %v2795_v3 = vpop.eup %2794 }
 0x56f   : > { %v2797_v5 = vpop.eup %2796  ;;  %v1559_v6 = vpop.permute.xlu0 %1558  ;;  %v1415_v8 = vmul.f32 %v2795_v3, %v3264_v37 }
 0x570   : > { %v2799_v13 = vpop.eup %2798  ;;  %v1568_v15 = vand.u32 %v1559_v6, %v3257_v31  ;;  %v1414_v20 = vmul.f32 %v2797_v5, %v3240_v61 }
 0x571   : > { %v1425_v16 = vpack.c.bf16 %v1416_v12, %v1415_v8  ;;  %v1412_v24 = vmul.f32 %v2799_v13, %v3245_v1  ;;  %v1630_v1 = vand.u32 %v1621_v22, %v3257_v31 }
 0x572   : > { %v2801_v17 = vpop.eup %2800  ;;  %2591 = vmatprep.subr.bf16.mxu1 %v1568_v15  ;;  %v1424_v32 = vpack.c.bf16 %v1414_v20, %v1414_v20 }
 0x573   : > { %2592 = vmatpush3.bf16.msra.mxu1 %v1568_v15  ;;  %2593 = vmatprep.mubr.msk.bf16.mxu1 %vm1287_vm6, %v1425_v16  ;;  %v1413_v25 = vmul.f32 %v2801_v17, %v3267_v41  ;;  %v2446_v17 = vld [vmem:[%s3479_s14] ss:$0 sm:$0xff] }
 0x574   : > { %v2803_v26 = vpop.eup %2802  ;;  %2605 = vmatprep.subr.bf16.mxu1 %v2746_v44 }
 0x575   : > { %v1423_v28 = vpack.c.bf16 %v1413_v25, %v1412_v24  ;;  %v1418_v61 = vmul.f32 %v2803_v26, %v3277_v4 }
 0x576   : > { %v2805_v29 = vpop.eup %2804  ;;  %2594 = vmatmul.mubr.msk.bf16.vlgmr.msra.gmra.mrb[12].mxu1 %vm1287_vm6, %v1426_v27 }
 0x577   : > { %v2807_v33 = vpop.eup %2806  ;;  %2585 = vmatprep.mubr.msk.bf16.mxu0 %vm1287_vm6, %v1423_v28  ;;  %v1419_v34 = vmul.f32 %v2805_v29, %v3282_v7  ;;  %2606 = vmatpush3.bf16.msra.mxu1 %v2746_v44 }
 0x578   : > { %2586 = vmatmul.mubr.msk.bf16.vlgmr.msra.gmra.mrb[12].mxu0 %vm1287_vm6, %v1424_v32  ;;  %v1420_v37 = vmul.f32 %v2807_v33, %v3271_v43  ;;  %2607 = vmatprep.subr.bf16.mxu1 %v2747_v48 }
 0x579   : > { %2598 = vmatpush3.bf16.msra.mxu0 %v3273_v19  ;;  %v1427_v35 = vpack.c.bf16 %v1419_v34, %v1418_v61 }
 0x57a   : > { %2599 = vmatprep.subr.bf16.mxu0 %v1630_v1  ;;  %v1428_v38 = vpack.c.bf16 %v1420_v37, %v1420_v37 }
 0x57b   : > { %2601 = vmatprep.mubr.msk.bf16.mxu0 %vm1287_vm6, %v1427_v35  ;;  %2608 = vmatpush3.bf16.msra.mxu1 %v2747_v48 }
 0x57d   : > { %2600 = vmatpush3.bf16.msra.mxu0 %v1630_v1 }
 0x580   : > { %2602 = vmatmul.mubr.msk.bf16.vlgmr.msra.gmra.mrb[16].mxu0 %vm1287_vm6, %v1428_v38 }
 0x5ec   : > { %v2579_v39 = vpop.f32.mrb[8].mxu1 }
 0x5ed   : > { %v1480_v40 = vpop.f32.mrb[9].mxu1 }
 0x5ee   : > { %v2580_v41 = vpop.f32.mrb[10].mxu1 }
 0x5ef   : > { %v1483_v42 = vpop.f32.mrb[11].mxu1 }
 0x649   : > { %v2595_v31 = vpop.f32.mrb[12].mxu1 }
 0x64a   : > { %v1604_v4 = vpop.f32.mrb[13].mxu1 }
 0x64b   : > { %v2587_v45 = vpop.f32.mrb[12].mxu0  ;;  %v2596_v19 = vpop.f32.mrb[14].mxu1 }
 0x64c   : > { %1687 = vrot.lane.b32.xlu1 %v2587_v45, %s2874_s0  ;;  %v1542_v43 = vpop.f32.mrb[13].mxu0  ;;  %v1607_v7 = vpop.f32.mrb[15].mxu1 }
 0x64d   : > { %v2734_v18 = vpack.i.bf16 %v1607_v7, %v1604_v4  ;;  %v2588_v30 = vpop.f32.mrb[14].mxu0  ;;  %v2749_v7 = vld [vmem:[%s3049_s28 + $0x8] sm:$0xff]  }
 0x64e   : > { %v1545_v49 = vpop.f32.mrb[15].mxu0 }
 0x64f   : > { %v2729_v50 = vpack.i.bf16 %v1545_v49, %v1542_v43  ;;  %v2748_v43 = vld [vmem:[%s3049_s28] sm:$0xff]  }
 0x650   : > { %1699 = vrot.lane.b32.xlu1 %v2595_v31, %s2875_s21  ;;  %2613 = vmatprep.subr.bf16.mxu0 %v2748_v43 }
 0x651   : > { %2730 = vrot.lane.b32.xlu0 %v2729_v50, %s2874_s0  ;;  %2614 = vmatpush3.bf16.msra.mxu0 %v2748_v43 }
 0x652   : > { %2615 = vmatprep.subr.bf16.mxu0 %v2749_v7 }
 0x653   : > { %v2603_v51 = vpop.f32.mrb[16].mxu0 }
 0x654   : > { %1711 = vrot.lane.b32.xlu1 %v2603_v51, %s2876_s24  ;;  %v1666_v52 = vpop.f32.mrb[17].mxu0 }
 0x655   : > { %2735 = vrot.lane.b32.xlu0 %v2734_v18, %s2875_s21  ;;  %v2604_v53 = vpop.f32.mrb[18].mxu0  ;;  %2616 = vmatpush3.bf16.msra.mxu0 %v2749_v7 }
 0x656   : > { %v1669_v54 = vpop.f32.mrb[19].mxu0 }
 0x657   : > { %v2739_v55 = vpack.i.bf16 %v1669_v54, %v1666_v52 }
 0x659   : > { %2740 = vrot.lane.b32.xlu0 %v2739_v55, %s2876_s24 }
 0x6be   : > { %v1688_v56 = vpop.permute.xlu1 %1687 }
 0x6bf   : > { %v1718_v46 = vsel %vm1028_vm4, %v2579_v39, %v1688_v56 }
 0x6c2   : > { %v1700_v36 = vpop.permute.xlu1 %1699 }
 0x6c3   : > { %v2731_v57 = vpop.permute.xlu0 %2730  ;;  %v1722_v47 = vsel %vm1719_vm8, %v1718_v46, %v1700_v36  ;;  %v2452_v46 = vld [vmem:[%s3481_s25] ss:$0 sm:$0xff] }
 0x6c4   : > { %v2733_v58 = vunpack.i.h.bf16 %v2731_v57  ;;  %v2732_v59 = vunpack.i.l.bf16 %v2731_v57  ;;  %v2451_v57 = vld [vmem:[%s3480_s17] ss:$0 sm:$0xff] }
 0x6c6   : > { %v1712_v21 = vpop.permute.xlu1 %1711  ;;  %v1717_v0 = vsel %vm1028_vm4, %v1483_v42, %v2733_v58  ;;  %v1716_v2 = vsel %vm1028_vm4, %v1480_v40, %v2732_v59 }
 0x6c7   : > { %v2736_v23 = vpop.permute.xlu0 %2735  ;;  %v1726_v6 = vsel %vm1723_vm9, %v1722_v47, %v1712_v21 }
 0x6c8   : > { %v2738_v60 = vunpack.i.h.bf16 %v2736_v23  ;;  %v2737_v62 = vunpack.i.l.bf16 %v2736_v23  ;;  %v1728_v16 = vpack.c.bf16 %v1726_v6, %v1726_v6  ;;  %v2751_v6 = vld [vmem:[%s3063_s1 + $0x8] sm:$0xff]  }
 0x6ca   : > { %v1721_v8 = vsel %vm1719_vm8, %v1717_v0, %v2738_v60  ;;  %v1720_v12 = vsel %vm1719_vm8, %v1716_v2, %v2737_v62 }
 0x6cb   : > { %v2741_v63 = vpop.permute.xlu0 %2740 }
 0x6cc   : > { %v2743_v3 = vunpack.i.h.bf16 %v2741_v63  ;;  %v2742_v5 = vunpack.i.l.bf16 %v2741_v63 }
 0x6ce   : > { %v1725_v13 = vsel %vm1723_vm9, %v1721_v8, %v2743_v3  ;;  %v1724_v14 = vsel %vm1723_vm9, %v1720_v12, %v2742_v5  ;;  %v2750_v5 = vld [vmem:[%s3063_s1] sm:$0xff]   ;;  %v2752_v8 = vld [vmem:[%s3063_s1 + $0x10] sm:$0xff]   ;;  %v2753_v12 = vld [vmem:[%s3063_s1 + $0x18] sm:$0xff]  }
 0x6cf   : > { %v1727_v15 = vpack.c.bf16 %v1725_v13, %v1724_v14  ;;  %2621 = vmatprep.subr.bf16.mxu1 %v2750_v5  ;;  %v2453_v13 = vld [vmem:[%s766_s18] ss:$0 sm:$0xff] }
 0x6d1   : > { %2609 = vmatprep.mubr.msk.bf16.mxu1 %vm804_vm2, %v1727_v15 }
 0x6d2   : > { %2610 = vmatmul.mubr.msk.bf16.vlgmr.msra.gmra.mrb[16].mxu1 %vm804_vm2, %v1728_v16 }
 0x6d3   : > { %2622 = vmatpush3.bf16.msra.mxu1 %v2750_v5 }
 0x6d4   : > { %2623 = vmatprep.subr.bf16.mxu1 %v2751_v6 }
 0x6d7   : > { %2624 = vmatpush3.bf16.msra.mxu1 %v2751_v6 }
 0x6d8   : > { %2625 = vmatprep.subr.bf16.mxu1 %v2752_v8 }
 0x6db   : > { %2626 = vmatpush3.bf16.msra.mxu1 %v2752_v8 }
 0x6dc   : > { %2627 = vmatprep.subr.bf16.mxu1 %v2753_v12 }
 0x6df   : > { %2628 = vmatpush3.bf16.msra.mxu1 %v2753_v12 }
 0x7a5   : > { %v2611_v20 = vpop.f32.mrb[16].mxu1 }
 0x7a6   : > { %v1792_v24 = vpop.f32.mrb[17].mxu1  ;;  %v1801_v25 = vadd.f32 %v2611_v20, %v2446_v17 }
 0x7a7   : > { %v1793_v26 = vadd.f32 %v2446_v17, %v1792_v24  ;;  %v2612_v27 = vpop.f32.mrb[18].mxu1 }
 0x7a8   : > { %v1795_v22 = vpop.f32.mrb[19].mxu1  ;;  %v3334_v32 = vadd.f32 %v1801_v25, %v3082_v10 }
 0x7a9   : > { %v3331_v28 = vadd.f32 %v1793_v26, %v3080_v9  ;;  %v1796_v29 = vadd.f32 %v2446_v17, %v1795_v22 }
 0x7aa   : > { %v1817_v1 = vsel %vm811_vm3, %v3334_v32, 0.0 }
 0x7ab   : > { %v3337_v33 = vadd.f32 %v1796_v29, %v3084_v11  ;;  %v1811_v61 = vsel %vm804_vm2, %v3331_v28, 0.0 }
 0x7ac   : > { %1812 = vadd.xlane.f32.xlu0 %v1811_v61 }
 0x7ad   : > { %v1814_v34 = vsel %vm804_vm2, %v3337_v33, 0.0 }
 0x7ae   : > { %1815 = vadd.xlane.f32.xlu1 %v1814_v34 }
 0x7b0   : > { %1818 = vadd.xlane.f32.xlu0 %v1817_v1 }
 0x839   : > { %v1813_v9 = vpop.xlane.xlu0 %1812 }
 0x83a   : > { %v1820_v35 = vmul.f32 0.03125, %v1813_v9 }
 0x83b   : > { %v1816_v37 = vpop.xlane.xlu1 %1815 }
 0x83c   : > { %v1823_v10 = vsub.f32 %v3331_v28, %v1820_v35  ;;  %v1821_v11 = vmul.f32 0.03125, %v1816_v37 }
 0x83d   : > { %v1819_v38 = vpop.xlane.xlu0 %1818 }
 0x83e   : > { %v1824_v39 = vsub.f32 %v3337_v33, %v1821_v11  ;;  %v1822_v40 = vmul.f32 0.03125, %v1819_v38  ;;  %v1826_v41 = vmul.f32 %v1823_v10, %v1823_v10 }
 0x840   : > { %v1825_v42 = vsub.f32 %v3334_v32, %v1822_v40  ;;  %v1829_v31 = vsel %vm804_vm2, %v1826_v41, 0.0  ;;  %v1827_v44 = vmul.f32 %v1824_v39, %v1824_v39 }
 0x841   : > { %1830 = vadd.xlane.f32.xlu0 %v1829_v31 }
 0x842   : > { %v1828_v4 = vmul.f32 %v1825_v42, %v1825_v42  ;;  %v1832_v45 = vsel %vm804_vm2, %v1827_v44, 0.0 }
 0x844   : > { %v1835_v19 = vsel %vm811_vm3, %v1828_v4, 0.0 }
 0x845   : > { %1833 = vadd.xlane.f32.xlu0 %v1832_v45  ;;  %1836 = vadd.xlane.f32.xlu1 %v1835_v19 }
 0x8ce   : > { %v1831_v18 = vpop.xlane.xlu0 %1830 }
 0x8cf   : > { %v1838_v30 = vmul.f32 0.03125, %v1831_v18 }
 0x8d1   : > { %v1841_v48 = vadd.f32 1e-05, %v1838_v30 }
 0x8d2   : > { %v1837_v49 = vpop.xlane.xlu1 %1836  ;;  %v1834_v50 = vpop.xlane.xlu0 %1833 }
 0x8d3   : > { %2808 = vrsqrt.f32 %v1841_v48  ;;  %v1840_v51 = vmul.f32 0.03125, %v1837_v49  ;;  %v1839_v52 = vmul.f32 0.03125, %v1834_v50 }
 0x8d5   : > { %v1843_v53 = vadd.f32 1e-05, %v1840_v51  ;;  %v1842_v54 = vadd.f32 1e-05, %v1839_v52  ;;  %v2458_v51 = vld [vmem:[%s774_s30] ss:$0 sm:$0xff] }
 0x8d7   : > { %2810 = vrsqrt.f32 %v1843_v53 }
 0x8d8   : > { %2812 = vrsqrt.f32 %v1842_v54 }
 0x8dd   : > { %v2809_v55 = vpop.eup %2808 }
 0x8de   : > { %v1847_v56 = vmul.f32 %v2809_v55, %v1823_v10 }
 0x8e0   : > { %v1856_v60 = vmul.f32 %v2451_v57, %v1847_v56 }
 0x8e1   : > { %v2811_v36 = vpop.eup %2810 }
 0x8e2   : > { %v2813_v23 = vpop.eup %2812  ;;  %v1849_v58 = vmul.f32 %v2811_v36, %v1825_v42  ;;  %v1865_v63 = vadd.f32 %v2452_v46, %v1856_v60 }
 0x8e3   : > { %v1848_v59 = vmul.f32 %v2813_v23, %v1824_v39 }
 0x8e4   : > { %v1858_v62 = vmul.f32 %v2451_v57, %v1849_v58 }
 0x8e5   : > { %v1857_v21 = vmul.f32 %v2451_v57, %v1848_v59 }
 0x8e6   : > { %v1867_v47 = vadd.f32 %v2452_v46, %v1858_v62 }
 0x8e7   : > { %v1866_v0 = vadd.f32 %v2452_v46, %v1857_v21 }
 0x8e8   : > { %v1869_v2 = vpack.c.bf16 %v1867_v47, %v1867_v47 }
 0x8e9   : > { %v1868_v3 = vpack.c.bf16 %v1866_v0, %v1865_v63 }
 0x8eb   : > { %2617 = vmatprep.mubr.msk.bf16.mxu0 %vm804_vm2, %v1868_v3 }
 0x8ec   : > { %2618 = vmatmul.mubr.msk.bf16.vlgmr.msra.gmra.mrb[20].mxu0 %vm804_vm2, %v1869_v2 }
 0x9bf   : > { %v2619_v14 = vpop.f32.mrb[20].mxu0 }
 0x9c0   : > { %v1942_v15 = vadd.f32 %v2619_v14, %v2453_v13  ;;  %v1933_v16 = vpop.f32.mrb[21].mxu0 }
 0x9c1   : > { %v1934_v17 = vadd.f32 %v2453_v13, %v1933_v16  ;;  %v2620_v20 = vpop.f32.mrb[22].mxu0  ;;  %v2821_v16 = vld [vmem:[%s3483_s16 + $0x8] sm:$0xff] (!%p2465_p8)  }
 0x9c2   : > { %v1949_v24 = vmul.f32 %v1942_v15, %v1942_v15  ;;  %v1936_v25 = vpop.f32.mrb[23].mxu0 }
 0x9c3   : > { %v1947_v26 = vmul.f32 %v1934_v17, %v1934_v17  ;;  %v1937_v27 = vadd.f32 %v2453_v13, %v1936_v25 }
 0x9c4   : > { %v1952_v22 = vmul.f32 %v1949_v24, %v1942_v15 }
 0x9c5   : > { %v1950_v29 = vmul.f32 %v1947_v26, %v1934_v17  ;;  %v1948_v61 = vmul.f32 %v1937_v27, %v1937_v27 }
 0x9c6   : > { %v1955_v34 = vmul.f32 0.044715, %v1952_v22 }
 0x9c7   : > { %v1953_v1 = vmul.f32 0.044715, %v1950_v29  ;;  %v1951_v9 = vmul.f32 %v1948_v61, %v1937_v27 }
 0x9c8   : > { %v1958_v35 = vadd.f32 %v1955_v34, %v1942_v15 }
 0x9c9   : > { %v1956_v37 = vadd.f32 %v1953_v1, %v1934_v17  ;;  %v1954_v10 = vmul.f32 0.044715, %v1951_v9  ;;  %v2466_v9 = vld [vmem:[%s3484_s19] ss:$0 sm:$0xff] (!%p2465_p8) }
 0x9ca   : > { %v1961_v11 = vmul.f32 0.7978846, %v1958_v35 }
 0x9cb   : > { %v1959_v38 = vmul.f32 0.7978846, %v1956_v37  ;;  %v1957_v39 = vadd.f32 %v1954_v10, %v1937_v27 }
 0x9cc   : > { %2814 = vtanh.f32 %v1961_v11 }
 0x9cd   : > { %2816 = vtanh.f32 %v1959_v38  ;;  %v1960_v40 = vmul.f32 0.7978846, %v1957_v39  ;;  %v2467_v39 = vld [vmem:[%s3485_s15] ss:$0 sm:$0xff] (!%p2465_p8) }
 0x9cf   : > { %2818 = vtanh.f32 %v1960_v40 }
 0x9d6   : > { %v2815_v41 = vpop.eup %2814 }
 0x9d7   : > { %v2817_v42 = vpop.eup %2816  ;;  %v1967_v31 = vadd.f32 1.0, %v2815_v41 }
 0x9d8   : > { %v1965_v44 = vadd.f32 1.0, %v2817_v42 }
 0x9d9   : > { %v2819_v4 = vpop.eup %2818  ;;  %v1970_v45 = vmul.f32 0.5, %v1967_v31 }
 0x9da   : > { %v1968_v19 = vmul.f32 0.5, %v1965_v44  ;;  %v1966_v43 = vadd.f32 1.0, %v2819_v4 }
 0x9db   : > { %v1973_v18 = vmul.f32 %v1970_v45, %v1942_v15  ;;  %v2820_v15 = vld [vmem:[%s3483_s16] sm:$0xff] (!%p2465_p8)  }
 0x9dc   : > { %v1969_v7 = vmul.f32 0.5, %v1966_v43  ;;  %v1971_v30 = vmul.f32 %v1968_v19, %v1934_v17  ;;  %2633 = vmatprep.subr.bf16.mxu0 (!%p2465_p8), %v2820_v15  ;;  %v2468_v19 = vld [vmem:[%s3486_s22] ss:$0 sm:$0xff] (!%p2465_p8) }
 0x9dd   : > { %v1975_v50 = vpack.c.bf16 %v1973_v18, %v1973_v18  ;;  %2634 = vmatpush3.bf16.msra.mxu0 (!%p2465_p8), %v2820_v15 }
 0x9de   : > { %v1972_v48 = vmul.f32 %v1969_v7, %v1937_v27  ;;  %2635 = vmatprep.subr.bf16.mxu0 (!%p2465_p8), %v2821_v16 }
 0x9e0   : > { %v1974_v49 = vpack.c.bf16 %v1972_v48, %v1971_v30 }
 0x9e1   : > { %2636 = vmatpush3.bf16.msra.mxu0 (!%p2465_p8), %v2821_v16 }
 0x9e2   : > { %2629 = vmatprep.mubr.msk.bf16.mxu1 %vm2015_vm10, %v1974_v49 }
 0x9e3   : > { %2630 = vmatmul.mubr.msk.bf16.vlgmr.msra.gmra.mrb[20].mxu1 %vm2015_vm10, %v1975_v50 }
 0xab6   : > { %v2631_v52 = vpop.f32.mrb[20].mxu1 }
 0xab7   : > { %v2065_v53 = vadd.f32 %v2631_v52, %v2458_v51  ;;  %v2056_v54 = vpop.f32.mrb[21].mxu1 }
 0xab8   : > { %v2057_v55 = vadd.f32 %v2458_v51, %v2056_v54  ;;  %v2632_v56 = vpop.f32.mrb[22].mxu1  ;;  %2079 = sbr.rel (%p2465_p8) target bundleno = 3287 (0xcd7), region = 100 }
 0xab9   : > { %v2072_v57 = vadd.f32 %v2065_v53, %v3334_v32  ;;  %v2059_v36 = vpop.f32.mrb[23].mxu1 }
 0xaba   : > { %v2070_v23 = vadd.f32 %v2057_v55, %v3331_v28  ;;  %v2060_v58 = vadd.f32 %v2458_v51, %v2059_v36 }
 0xabb   : > { %2075 = vst.msk [vmem:[#allocation2 + $0x10] sm:$0x1] %vm811_vm3, %v2072_v57  ;;  %v2088_v62 = vsel (!%p2465_p8), %vm811_vm3, %v2072_v57, 0.0 }
 0xabc   : > { %2073 = vst.msk [vmem:[#allocation2] sm:$0xff] %vm804_vm2, %v2070_v23  ;;  %v2071_v59 = vadd.f32 %v2060_v58, %v3337_v33  ;;  %v2082_v60 = vsel (!%p2465_p8), %vm804_vm2, %v2070_v23, 0.0  ;;  %2089 = vadd.xlane.f32.xlu1 (!%p2465_p8), %v2088_v62 }
 0xabd   : > { %2083 = vadd.xlane.f32.xlu0 (!%p2465_p8), %v2082_v60 }
 0xabe   : > { %2074 = vst.msk [vmem:[#allocation2 + $0x8] sm:$0xff] %vm804_vm2, %v2071_v59  ;;  %v2085_v28 = vsel (!%p2465_p8), %vm804_vm2, %v2071_v59, 0.0 }
 0xac1   : > { %2086 = vadd.xlane.f32.xlu0 %v2085_v28 }
 0xb49   : > { %v2090_v46 = vpop.xlane.xlu1 %2089 }
 0xb4a   : > { %v2084_v32 = vpop.xlane.xlu0 %2083  ;;  %v2093_v47 = vmul.f32 0.03125, %v2090_v46 }
 0xb4b   : > { %v2091_v21 = vmul.f32 0.03125, %v2084_v32 }
 0xb4c   : > { %v2096_v33 = vsub.f32 %v2072_v57, %v2093_v47 }
 0xb4d   : > { %v2094_v63 = vsub.f32 %v2070_v23, %v2091_v21 }
 0xb4e   : > { %v2087_v0 = vpop.xlane.xlu0 %2086  ;;  %v2099_v5 = vmul.f32 %v2096_v33, %v2096_v33 }
 0xb4f   : > { %v2092_v2 = vmul.f32 0.03125, %v2087_v0  ;;  %v2097_v3 = vmul.f32 %v2094_v63, %v2094_v63 }
 0xb50   : > { %v2106_v12 = vsel %vm811_vm3, %v2099_v5, 0.0 }
 0xb51   : > { %v2095_v6 = vsub.f32 %v2071_v59, %v2092_v2  ;;  %v2100_v8 = vsel %vm804_vm2, %v2097_v3, 0.0 }
 0xb52   : > { %2101 = vadd.xlane.f32.xlu1 %v2100_v8 }
 0xb53   : > { %v2098_v13 = vmul.f32 %v2095_v6, %v2095_v6 }
 0xb55   : > { %v2103_v14 = vsel %vm804_vm2, %v2098_v13, 0.0 }
 0xb56   : > { %2107 = vadd.xlane.f32.xlu1 %v2106_v12  ;;  %2104 = vadd.xlane.f32.xlu0 %v2103_v14 }
 0xbdf   : > { %v2102_v17 = vpop.xlane.xlu1 %2101 }
 0xbe0   : > { %v2109_v20 = vmul.f32 0.03125, %v2102_v17 }
 0xbe2   : > { %v2112_v24 = vadd.f32 1e-05, %v2109_v20 }
 0xbe3   : > { %v2108_v25 = vpop.xlane.xlu1 %2107  ;;  %v2105_v26 = vpop.xlane.xlu0 %2104 }
 0xbe4   : > { %2822 = vrsqrt.f32 %v2112_v24  ;;  %v2111_v27 = vmul.f32 0.03125, %v2108_v25  ;;  %v2110_v22 = vmul.f32 0.03125, %v2105_v26 }
 0xbe6   : > { %v2114_v29 = vadd.f32 1e-05, %v2111_v27  ;;  %v2113_v61 = vadd.f32 1e-05, %v2110_v22 }
 0xbe8   : > { %2824 = vrsqrt.f32 %v2114_v29 }
 0xbe9   : > { %2826 = vrsqrt.f32 %v2113_v61 }
 0xbee   : > { %v2823_v34 = vpop.eup %2822 }
 0xbef   : > { %v2118_v1 = vmul.f32 %v2823_v34, %v2094_v63 }
 0xbf1   : > { %v2127_v38 = vmul.f32 %v2466_v9, %v2118_v1 }
 0xbf2   : > { %v2825_v35 = vpop.eup %2824 }
 0xbf3   : > { %v2827_v37 = vpop.eup %2826  ;;  %v2120_v10 = vmul.f32 %v2825_v35, %v2096_v33  ;;  %v2136_v31 = vadd.f32 %v2467_v39, %v2127_v38 }
 0xbf4   : > { %v2119_v11 = vmul.f32 %v2827_v37, %v2095_v6 }
 0xbf5   : > { %v2129_v40 = vmul.f32 %v2466_v9, %v2120_v10 }
 0xbf6   : > { %v2128_v41 = vmul.f32 %v2466_v9, %v2119_v11 }
 0xbf7   : > { %v2138_v42 = vadd.f32 %v2467_v39, %v2129_v40 }
 0xbf8   : > { %v2137_v44 = vadd.f32 %v2467_v39, %v2128_v41 }
 0xbf9   : > { %v2140_v4 = vpack.c.bf16 %v2138_v42, %v2138_v42 }
 0xbfa   : > { %v2139_v45 = vpack.c.bf16 %v2137_v44, %v2136_v31 }
 0xbfc   : > { %2637 = vmatprep.mubr.msk.bf16.mxu0 %vm804_vm2, %v2139_v45 }
 0xbfd   : > { %2638 = vmatmul.mubr.msk.bf16.vlgmr.msra.gmra.mrb[0].mxu0 %vm804_vm2, %v2140_v4 }
 0xcd0   : > { %v2639_v43 = vpop.f32.mrb[0].mxu0 }
 0xcd1   : > { %v2213_v7 = vadd.f32 %v2639_v43, %v2468_v19  ;;  %v2204_v18 = vpop.f32.mrb[1].mxu0 }
 0xcd2   : > { %v2205_v30 = vadd.f32 %v2468_v19, %v2204_v18  ;;  %v2640_v48 = vpop.f32.mrb[2].mxu0 }
 0xcd3   : > { %2220 = vst [vmem:[%s3068_s4 + $0x10] sm:$0x1] %v2213_v7  ;;  %v2207_v49 = vpop.f32.mrb[3].mxu0 }
 0xcd4   : > { %2218 = vst [vmem:[%s3068_s4] sm:$0xff] %v2205_v30  ;;  %v2208_v50 = vadd.f32 %v2468_v19, %v2207_v49 }
 0xcd6   : > { %2219 = vst [vmem:[%s3068_s4 + $0x8] sm:$0xff] %v2208_v50 }
 0xcd7 PF: > { %s3487_s25 = sld [smem:[#allocation6_spill]]  ;;  %s3488_s27 = sld [smem:[#allocation4_spill]] }
 0xcd8   : > { %s3489_s28 = sld [smem:[#allocation5_spill]]  ;;  %s3490_s29 = sld [smem:[#allocation7_spill]] }
 0xcd9   : > { %s3491_s30 = sld [smem:[#allocation8_spill]] }
 0xcdd   : > { %s28_s0 = sadd.s32 1, %s3487_s25  }
 0xcde   : > { %p25_p9 = scmp.ge.s32.totalorder %s28_s0, 6  }
 0xce0   :  { %27 = sbr.rel (!%p25_p9) target bundleno = 11 (0xb), region = 166 }

</bundles_post_ra>
